<compile_context>
chip_gen: v7x
topology: tpu7x:2x2x1
jax: 0.10.0
libtpu: 0.0.40
codegen_flags: <defaults>
</compile_context>

<pallas_src>
import jax
import jax.numpy as jnp
from jax.experimental import pallas as pl
from jax.experimental.pallas import tpu as pltpu

# ---------------- model config (small, deterministic) --------------------------
B = 2            # batch
S = 8            # decoder sequence length
SE = 8           # encoder sequence length
D = 128          # model_dimension (lane-dense)
H = 4            # head_count
DH = D // H      # per-head dim
FF = 4 * D       # FFN hidden dim
# TODO(synk): FeedForward(model_dimension, head_count, ...) hidden size is not
# specified in the reference module; using the conventional 4*model_dimension.
EPS = 1e-6
NEG = -1e9
BF16 = jnp.bfloat16


# ---------------- shared math (used both in-kernel and for the reference) ------

def _layer_norm(x, g, b):
    mu = jnp.mean(x, axis=-1, keepdims=True)
    xc = x - mu
    var = jnp.mean(xc * xc, axis=-1, keepdims=True)
    return xc * jax.lax.rsqrt(var + EPS) * g + b


def _softmax_rows(s):
    m = jnp.max(s, axis=-1, keepdims=True)
    e = jnp.exp(s - m)
    return e / jnp.sum(e, axis=-1, keepdims=True)


def _attention_heads(q, kv, bias):
    """q: (Mq, D) f32 (already scaled), kv: (Mk, 2D) f32 (k | v), bias: (Mq, Mk)."""
    outs = []
    for h in range(H):                                  # static unroll over heads
        qh = q[:, h * DH:(h + 1) * DH]
        kh = kv[:, h * DH:(h + 1) * DH]
        vh = kv[:, D + h * DH:D + (h + 1) * DH]
        # q @ k^T without an explicit transpose (contract last dims on both sides)
        s = jax.lax.dot_general(qh, kh, (((1,), (1,)), ((), ())),
                                preferred_element_type=jnp.float32)
        p = _softmax_rows(s + bias)
        outs.append(jnp.dot(p, vh, preferred_element_type=jnp.float32))
    return jnp.concatenate(outs, axis=-1)               # (Mq, D)


def _decoder_layer_math(x, enc, tbias, sbias, params):
    """x: (B*S, D) f32, enc: (B*SE, D) f32, biases are additive (0 / -1e9)."""
    (vecs, bqkv1, bkv2, b1, wqkv1, wo1, wq2, wkv2, wo2, w1, w2) = params
    ln1_g, ln1_b, bo1 = vecs[0:1], vecs[1:2], vecs[2:3]
    ln2_g, ln2_b, bq2, bo2 = vecs[3:4], vecs[4:5], vecs[5:6], vecs[6:7]
    ln3_g, ln3_b, b2 = vecs[7:8], vecs[8:9], vecs[9:10]

    # --- masked self-attention (pre-LN); dropout == identity -------------------
    a = _layer_norm(x, ln1_g, ln1_b).astype(BF16)
    qkv = jnp.dot(a, wqkv1, preferred_element_type=jnp.float32) + bqkv1   # (M, 3D)
    att = _attention_heads(qkv[:, :D], qkv[:, D:], tbias)
    att = jnp.dot(att.astype(BF16), wo1, preferred_element_type=jnp.float32) + bo1
    x = x + att

    # --- encoder-decoder cross-attention ---------------------------------------
    a = _layer_norm(x, ln2_g, ln2_b).astype(BF16)
    q = jnp.dot(a, wq2, preferred_element_type=jnp.float32) + bq2
    kv = jnp.dot(enc.astype(BF16), wkv2, preferred_element_type=jnp.float32) + bkv2
    att = _attention_heads(q, kv, sbias)
    att = jnp.dot(att.astype(BF16), wo2, preferred_element_type=jnp.float32) + bo2
    x = x + att

    # --- feed-forward -----------------------------------------------------------
    f = _layer_norm(x, ln3_g, ln3_b).astype(BF16)
    h1 = jnp.maximum(jnp.dot(f, w1, preferred_element_type=jnp.float32) + b1, 0.0)
    f2 = jnp.dot(h1.astype(BF16), w2, preferred_element_type=jnp.float32) + b2
    return x + f2


# ---------------- Pallas kernel -------------------------------------------------

def decoder_layer_kernel(x_ref, enc_ref, tbias_ref, sbias_ref,
                         vecs_ref, bqkv1_ref, bkv2_ref, b1_ref,
                         wqkv1_ref, wo1_ref, wq2_ref, wkv2_ref, wo2_ref,
                         w1_ref, w2_ref, out_ref):
    params = (vecs_ref[...], bqkv1_ref[...], bkv2_ref[...], b1_ref[...],
              wqkv1_ref[...], wo1_ref[...], wq2_ref[...], wkv2_ref[...],
              wo2_ref[...], w1_ref[...], w2_ref[...])
    out_ref[...] = _decoder_layer_math(x_ref[...], enc_ref[...],
                                       tbias_ref[...], sbias_ref[...], params)


def block_diag_bias(mask):
    """(B, Sq, Sk) keep-mask (1=attend) -> (B*Sq, B*Sk) additive bias.

    Cross-batch positions get -1e9, so folding batch into the row dimension is
    numerically exact (masked probabilities underflow to exactly 0)."""
    Bb, Sq, Sk = mask.shape
    same_batch = jnp.arange(Bb)[:, None] == jnp.arange(Bb)[None, :]       # (B, B)
    keep = (mask > 0)[:, :, None, :] & same_batch[:, None, :, None]       # (B,Sq,B,Sk)
    keep = keep.reshape(Bb * Sq, Bb * Sk)
    return jnp.where(keep, 0.0, NEG).astype(jnp.float32)


def decoder_layer(x, enc, tmask, smask, packed):
    Bb, Ss, Dd = x.shape
    Se = enc.shape[1]
    xf = x.reshape(Bb * Ss, Dd)
    ef = enc.reshape(Bb * Se, Dd)
    tbias = block_diag_bias(tmask)
    sbias = block_diag_bias(smask)
    n_in = 4 + len(packed)
    out = pl.pallas_call(
        decoder_layer_kernel,
        out_shape=jax.ShapeDtypeStruct((Bb * Ss, Dd), jnp.float32),
        in_specs=[pl.BlockSpec(memory_space=pltpu.MemorySpace.VMEM)] * n_in,
        out_specs=pl.BlockSpec(memory_space=pltpu.MemorySpace.VMEM),
        compiler_params=pltpu.CompilerParams(vmem_limit_bytes=32 << 20),
    )(xf, ef, tbias, sbias, *packed)
    return out.reshape(Bb, Ss, Dd)


# ---------------- parameter init / packing -------------------------------------

def init_params(key):
    ks = iter(jax.random.split(key, 40))

    def lin(kin, kout):
        w = jax.random.normal(next(ks), (kin, kout), jnp.float32) / jnp.sqrt(kin)
        b = jax.random.normal(next(ks), (1, kout), jnp.float32) * 0.01
        return w, b

    ln = lambda: (jnp.ones((1, D), jnp.float32), jnp.zeros((1, D), jnp.float32))
    p = {
        "ln1": ln(),
        "attn1": {n: lin(D, D) for n in ("q", "k", "v", "o")},
        "ln2": ln(),
        "attn2": {n: lin(D, D) for n in ("q", "k", "v", "o")},
        "ln3": ln(),
        "ffn": (lin(D, FF), lin(FF, D)),
    }
    return p


def pack_params(p):
    """Fuse QKV / KV weights, fold the softmax scale into Q, pack small vectors,
    and cast weight matrices to bfloat16 (biases stay f32)."""
    scale = 1.0 / jnp.sqrt(jnp.float32(DH))
    (wq1, bq1), (wk1, bk1), (wv1, bv1), (wo1, bo1) = (p["attn1"][n] for n in ("q", "k", "v", "o"))
    (wq2, bq2), (wk2, bk2), (wv2, bv2), (wo2, bo2) = (p["attn2"][n] for n in ("q", "k", "v", "o"))
    (w1, b1), (w2, b2) = p["ffn"]
    ln1_g, ln1_b = p["ln1"]
    ln2_g, ln2_b = p["ln2"]
    ln3_g, ln3_b = p["ln3"]

    wqkv1 = jnp.concatenate([wq1 * scale, wk1, wv1], axis=1).astype(BF16)   # (D, 3D)
    bqkv1 = jnp.concatenate([bq1 * scale, bk1, bv1], axis=1)                # (1, 3D) f32
    wkv2 = jnp.concatenate([wk2, wv2], axis=1).astype(BF16)                 # (D, 2D)
    bkv2 = jnp.concatenate([bk2, bv2], axis=1)                              # (1, 2D) f32
    vecs = jnp.concatenate([ln1_g, ln1_b, bo1,
                            ln2_g, ln2_b, bq2 * scale, bo2,
                            ln3_g, ln3_b, b2], axis=0)                      # (10, D) f32

    return (vecs, bqkv1, bkv2, b1,
            wqkv1, wo1.astype(BF16),
            (wq2 * scale).astype(BF16), wkv2, wo2.astype(BF16),
            w1.astype(BF16), w2.astype(BF16))


# ---------------- main ----------------------------------------------------------

if __name__ == "__main__":
    key = jax.random.PRNGKey(0)
    kx, ke, kp = jax.random.split(key, 3)

    x = jax.random.normal(kx, (B, S, D), jnp.float32)
    enc = jax.random.normal(ke, (B, SE, D), jnp.float32)

    # causal target mask, all-ones source mask (1 = attend, 0 = masked out)
    tmask = jnp.tril(jnp.ones((S, S), jnp.float32))[None].repeat(B, axis=0)
    smask = jnp.ones((B, S, SE), jnp.float32)

    packed = pack_params(init_params(kp))

    out = decoder_layer(x, enc, tmask, smask, packed)
    out = jax.block_until_ready(out)

    # pure-JAX reference on the same folded formulation / identical packed params
    xf = x.reshape(B * S, D)
    ef = enc.reshape(B * SE, D)
    ref = _decoder_layer_math(xf, ef, block_diag_bias(tmask), block_diag_bias(smask), packed)
    ref = jax.block_until_ready(ref).reshape(B, S, D)

    assert out.shape == (B, S, D)
    assert jnp.allclose(out, ref, rtol=1e-3, atol=1e-3), "mismatch vs reference"
    print("KERNEL_OK")
</pallas_src>

<mosaic_0001>
module attributes {stable_mosaic.version = 11 : i64} {
  func.func @decoder_layer_kernel(%arg0: memref<16x128xf32, #tpu.memory_space<vmem>>, %arg1: memref<16x128xf32, #tpu.memory_space<vmem>>, %arg2: memref<16x16xf32, #tpu.memory_space<vmem>>, %arg3: memref<16x16xf32, #tpu.memory_space<vmem>>, %arg4: memref<10x128xf32, #tpu.memory_space<vmem>>, %arg5: memref<1x384xf32, #tpu.memory_space<vmem>>, %arg6: memref<1x256xf32, #tpu.memory_space<vmem>>, %arg7: memref<1x512xf32, #tpu.memory_space<vmem>>, %arg8: memref<128x384xbf16, #tpu.memory_space<vmem>>, %arg9: memref<128x128xbf16, #tpu.memory_space<vmem>>, %arg10: memref<128x128xbf16, #tpu.memory_space<vmem>>, %arg11: memref<128x256xbf16, #tpu.memory_space<vmem>>, %arg12: memref<128x128xbf16, #tpu.memory_space<vmem>>, %arg13: memref<128x512xbf16, #tpu.memory_space<vmem>>, %arg14: memref<512x128xbf16, #tpu.memory_space<vmem>>, %arg15: memref<16x128xf32, #tpu.memory_space<vmem>>) attributes {dimension_semantics = [], scalar_prefetch = 0 : i64, scratch_operands = 0 : i64, tpu.core_type = #tpu.core_type<tc>} {
    %c0 = arith.constant 0 : index
    %c0_0 = arith.constant 0 : index
    %0 = vector.load %arg4[%c0, %c0_0] : memref<10x128xf32, #tpu.memory_space<vmem>>, vector<10x128xf32>
    %c0_1 = arith.constant 0 : index
    %c0_2 = arith.constant 0 : index
    %1 = vector.load %arg5[%c0_1, %c0_2] : memref<1x384xf32, #tpu.memory_space<vmem>>, vector<1x384xf32>
    %c0_3 = arith.constant 0 : index
    %c0_4 = arith.constant 0 : index
    %2 = vector.load %arg6[%c0_3, %c0_4] : memref<1x256xf32, #tpu.memory_space<vmem>>, vector<1x256xf32>
    %c0_5 = arith.constant 0 : index
    %c0_6 = arith.constant 0 : index
    %3 = vector.load %arg7[%c0_5, %c0_6] : memref<1x512xf32, #tpu.memory_space<vmem>>, vector<1x512xf32>
    %c0_7 = arith.constant 0 : index
    %c0_8 = arith.constant 0 : index
    %4 = vector.load %arg8[%c0_7, %c0_8] : memref<128x384xbf16, #tpu.memory_space<vmem>>, vector<128x384xbf16>
    %c0_9 = arith.constant 0 : index
    %c0_10 = arith.constant 0 : index
    %5 = vector.load %arg9[%c0_9, %c0_10] : memref<128x128xbf16, #tpu.memory_space<vmem>>, vector<128x128xbf16>
    %c0_11 = arith.constant 0 : index
    %c0_12 = arith.constant 0 : index
    %6 = vector.load %arg10[%c0_11, %c0_12] : memref<128x128xbf16, #tpu.memory_space<vmem>>, vector<128x128xbf16>
    %c0_13 = arith.constant 0 : index
    %c0_14 = arith.constant 0 : index
    %7 = vector.load %arg11[%c0_13, %c0_14] : memref<128x256xbf16, #tpu.memory_space<vmem>>, vector<128x256xbf16>
    %c0_15 = arith.constant 0 : index
    %c0_16 = arith.constant 0 : index
    %8 = vector.load %arg12[%c0_15, %c0_16] : memref<128x128xbf16, #tpu.memory_space<vmem>>, vector<128x128xbf16>
    %c0_17 = arith.constant 0 : index
    %c0_18 = arith.constant 0 : index
    %9 = vector.load %arg13[%c0_17, %c0_18] : memref<128x512xbf16, #tpu.memory_space<vmem>>, vector<128x512xbf16>
    %c0_19 = arith.constant 0 : index
    %c0_20 = arith.constant 0 : index
    %10 = vector.load %arg14[%c0_19, %c0_20] : memref<512x128xbf16, #tpu.memory_space<vmem>>, vector<512x128xbf16>
    %c0_21 = arith.constant 0 : index
    %c0_22 = arith.constant 0 : index
    %11 = vector.load %arg0[%c0_21, %c0_22] : memref<16x128xf32, #tpu.memory_space<vmem>>, vector<16x128xf32>
    %c0_23 = arith.constant 0 : index
    %c0_24 = arith.constant 0 : index
    %12 = vector.load %arg1[%c0_23, %c0_24] : memref<16x128xf32, #tpu.memory_space<vmem>>, vector<16x128xf32>
    %c0_25 = arith.constant 0 : index
    %c0_26 = arith.constant 0 : index
    %13 = vector.load %arg2[%c0_25, %c0_26] : memref<16x16xf32, #tpu.memory_space<vmem>>, vector<16x16xf32>
    %c0_27 = arith.constant 0 : index
    %c0_28 = arith.constant 0 : index
    %14 = vector.load %arg3[%c0_27, %c0_28] : memref<16x16xf32, #tpu.memory_space<vmem>>, vector<16x16xf32>
    %15 = vector.extract_strided_slice %0 {offsets = [0, 0], sizes = [1, 128], strides = [1, 1]} : vector<10x128xf32> to vector<1x128xf32>
    %16 = vector.extract_strided_slice %0 {offsets = [1, 0], sizes = [1, 128], strides = [1, 1]} : vector<10x128xf32> to vector<1x128xf32>
    %17 = vector.extract_strided_slice %0 {offsets = [2, 0], sizes = [1, 128], strides = [1, 1]} : vector<10x128xf32> to vector<1x128xf32>
    %18 = vector.extract_strided_slice %0 {offsets = [3, 0], sizes = [1, 128], strides = [1, 1]} : vector<10x128xf32> to vector<1x128xf32>
    %19 = vector.extract_strided_slice %0 {offsets = [4, 0], sizes = [1, 128], strides = [1, 1]} : vector<10x128xf32> to vector<1x128xf32>
    %20 = vector.extract_strided_slice %0 {offsets = [5, 0], sizes = [1, 128], strides = [1, 1]} : vector<10x128xf32> to vector<1x128xf32>
    %21 = vector.extract_strided_slice %0 {offsets = [6, 0], sizes = [1, 128], strides = [1, 1]} : vector<10x128xf32> to vector<1x128xf32>
    %22 = vector.extract_strided_slice %0 {offsets = [7, 0], sizes = [1, 128], strides = [1, 1]} : vector<10x128xf32> to vector<1x128xf32>
    %23 = vector.extract_strided_slice %0 {offsets = [8, 0], sizes = [1, 128], strides = [1, 1]} : vector<10x128xf32> to vector<1x128xf32>
    %24 = vector.extract_strided_slice %0 {offsets = [9, 0], sizes = [1, 128], strides = [1, 1]} : vector<10x128xf32> to vector<1x128xf32>
    %cst = arith.constant dense<0.000000e+00> : vector<16xf32>
    %25 = vector.multi_reduction <add>, %11, %cst [1] : vector<16x128xf32> to vector<16xf32>
    %26 = vector.shape_cast %25 : vector<16xf32> to vector<16x1xf32>
    %cst_29 = arith.constant 1.280000e+02 : f32
    %27 = vector.broadcast %cst_29 : f32 to vector<16x1xf32>
    %28 = arith.divf %26, %27 : vector<16x1xf32>
    %29 = vector.broadcast %28 : vector<16x1xf32> to vector<16x128xf32>
    %30 = arith.subf %11, %29 : vector<16x128xf32>
    %31 = arith.mulf %30, %30 : vector<16x128xf32>
    %cst_30 = arith.constant dense<0.000000e+00> : vector<16xf32>
    %32 = vector.multi_reduction <add>, %31, %cst_30 [1] : vector<16x128xf32> to vector<16xf32>
    %33 = vector.shape_cast %32 : vector<16xf32> to vector<16x1xf32>
    %cst_31 = arith.constant 1.280000e+02 : f32
    %34 = vector.broadcast %cst_31 : f32 to vector<16x1xf32>
    %35 = arith.divf %33, %34 : vector<16x1xf32>
    %cst_32 = arith.constant 9.99999997E-7 : f32
    %36 = vector.broadcast %cst_32 : f32 to vector<16x1xf32>
    %37 = arith.addf %35, %36 : vector<16x1xf32>
    %38 = math.rsqrt %37 : vector<16x1xf32>
    %39 = vector.broadcast %38 : vector<16x1xf32> to vector<16x128xf32>
    %40 = arith.mulf %30, %39 : vector<16x128xf32>
    %41 = vector.broadcast %15 : vector<1x128xf32> to vector<16x128xf32>
    %42 = arith.mulf %40, %41 : vector<16x128xf32>
    %43 = vector.broadcast %16 : vector<1x128xf32> to vector<16x128xf32>
    %44 = arith.addf %42, %43 : vector<16x128xf32>
    %45 = arith.truncf %44 : vector<16x128xf32> to vector<16x128xbf16>
    %cst_33 = arith.constant dense<0.000000e+00> : vector<16x384xf32>
    %46 = tpu.matmul %45, %4, %cst_33 {dimension_numbers = #tpu.dot_dimension_numbers<[1], [0], [0], [1], [0, 0, 1, 1], [], []>} : vector<16x128xbf16>, vector<128x384xbf16>, vector<16x384xf32> -> vector<16x384xf32>
    %47 = vector.broadcast %1 : vector<1x384xf32> to vector<16x384xf32>
    %48 = arith.addf %46, %47 : vector<16x384xf32>
    %49 = vector.extract_strided_slice %48 {offsets = [0, 0], sizes = [16, 128], strides = [1, 1]} : vector<16x384xf32> to vector<16x128xf32>
    %50 = vector.extract_strided_slice %48 {offsets = [0, 128], sizes = [16, 256], strides = [1, 1]} : vector<16x384xf32> to vector<16x256xf32>
    %51 = vector.extract_strided_slice %49 {offsets = [0, 0], sizes = [16, 32], strides = [1, 1]} : vector<16x128xf32> to vector<16x32xf32>
    %52 = vector.extract_strided_slice %50 {offsets = [0, 0], sizes = [16, 32], strides = [1, 1]} : vector<16x256xf32> to vector<16x32xf32>
    %53 = vector.extract_strided_slice %50 {offsets = [0, 128], sizes = [16, 32], strides = [1, 1]} : vector<16x256xf32> to vector<16x32xf32>
    %cst_34 = arith.constant dense<0.000000e+00> : vector<16x16xf32>
    %54 = tpu.matmul %51, %52, %cst_34 {dimension_numbers = #tpu.dot_dimension_numbers<[1], [1], [0], [0], [0, 0, 1, 0], [], []>} : vector<16x32xf32>, vector<16x32xf32>, vector<16x16xf32> -> vector<16x16xf32>
    %55 = arith.addf %54, %13 : vector<16x16xf32>
    %cst_35 = arith.constant dense<0xFF800000> : vector<16xf32>
    %56 = vector.multi_reduction <maximumf>, %55, %cst_35 [1] : vector<16x16xf32> to vector<16xf32>
    %57 = vector.shape_cast %56 : vector<16xf32> to vector<16x1xf32>
    %58 = vector.broadcast %57 : vector<16x1xf32> to vector<16x16xf32>
    %59 = arith.subf %55, %58 : vector<16x16xf32>
    %60 = math.exp %59 : vector<16x16xf32>
    %cst_36 = arith.constant dense<0.000000e+00> : vector<16xf32>
    %61 = vector.multi_reduction <add>, %60, %cst_36 [1] : vector<16x16xf32> to vector<16xf32>
    %62 = vector.shape_cast %61 : vector<16xf32> to vector<16x1xf32>
    %63 = vector.broadcast %62 : vector<16x1xf32> to vector<16x16xf32>
    %64 = arith.divf %60, %63 : vector<16x16xf32>
    %cst_37 = arith.constant dense<0.000000e+00> : vector<16x32xf32>
    %65 = tpu.matmul %64, %53, %cst_37 {dimension_numbers = #tpu.dot_dimension_numbers<[1], [0], [0], [1], [0, 0, 1, 1], [], []>} : vector<16x16xf32>, vector<16x32xf32>, vector<16x32xf32> -> vector<16x32xf32>
    %66 = vector.extract_strided_slice %49 {offsets = [0, 32], sizes = [16, 32], strides = [1, 1]} : vector<16x128xf32> to vector<16x32xf32>
    %67 = vector.extract_strided_slice %50 {offsets = [0, 32], sizes = [16, 32], strides = [1, 1]} : vector<16x256xf32> to vector<16x32xf32>
    %68 = vector.extract_strided_slice %50 {offsets = [0, 160], sizes = [16, 32], strides = [1, 1]} : vector<16x256xf32> to vector<16x32xf32>
    %cst_38 = arith.constant dense<0.000000e+00> : vector<16x16xf32>
    %69 = tpu.matmul %66, %67, %cst_38 {dimension_numbers = #tpu.dot_dimension_numbers<[1], [1], [0], [0], [0, 0, 1, 0], [], []>} : vector<16x32xf32>, vector<16x32xf32>, vector<16x16xf32> -> vector<16x16xf32>
    %70 = arith.addf %69, %13 : vector<16x16xf32>
    %cst_39 = arith.constant dense<0xFF800000> : vector<16xf32>
    %71 = vector.multi_reduction <maximumf>, %70, %cst_39 [1] : vector<16x16xf32> to vector<16xf32>
    %72 = vector.shape_cast %71 : vector<16xf32> to vector<16x1xf32>
    %73 = vector.broadcast %72 : vector<16x1xf32> to vector<16x16xf32>
    %74 = arith.subf %70, %73 : vector<16x16xf32>
    %75 = math.exp %74 : vector<16x16xf32>
    %cst_40 = arith.constant dense<0.000000e+00> : vector<16xf32>
    %76 = vector.multi_reduction <add>, %75, %cst_40 [1] : vector<16x16xf32> to vector<16xf32>
    %77 = vector.shape_cast %76 : vector<16xf32> to vector<16x1xf32>
    %78 = vector.broadcast %77 : vector<16x1xf32> to vector<16x16xf32>
    %79 = arith.divf %75, %78 : vector<16x16xf32>
    %cst_41 = arith.constant dense<0.000000e+00> : vector<16x32xf32>
    %80 = tpu.matmul %79, %68, %cst_41 {dimension_numbers = #tpu.dot_dimension_numbers<[1], [0], [0], [1], [0, 0, 1, 1], [], []>} : vector<16x16xf32>, vector<16x32xf32>, vector<16x32xf32> -> vector<16x32xf32>
    %81 = vector.extract_strided_slice %49 {offsets = [0, 64], sizes = [16, 32], strides = [1, 1]} : vector<16x128xf32> to vector<16x32xf32>
    %82 = vector.extract_strided_slice %50 {offsets = [0, 64], sizes = [16, 32], strides = [1, 1]} : vector<16x256xf32> to vector<16x32xf32>
    %83 = vector.extract_strided_slice %50 {offsets = [0, 192], sizes = [16, 32], strides = [1, 1]} : vector<16x256xf32> to vector<16x32xf32>
    %cst_42 = arith.constant dense<0.000000e+00> : vector<16x16xf32>
    %84 = tpu.matmul %81, %82, %cst_42 {dimension_numbers = #tpu.dot_dimension_numbers<[1], [1], [0], [0], [0, 0, 1, 0], [], []>} : vector<16x32xf32>, vector<16x32xf32>, vector<16x16xf32> -> vector<16x16xf32>
    %85 = arith.addf %84, %13 : vector<16x16xf32>
    %cst_43 = arith.constant dense<0xFF800000> : vector<16xf32>
    %86 = vector.multi_reduction <maximumf>, %85, %cst_43 [1] : vector<16x16xf32> to vector<16xf32>
    %87 = vector.shape_cast %86 : vector<16xf32> to vector<16x1xf32>
    %88 = vector.broadcast %87 : vector<16x1xf32> to vector<16x16xf32>
    %89 = arith.subf %85, %88 : vector<16x16xf32>
    %90 = math.exp %89 : vector<16x16xf32>
    %cst_44 = arith.constant dense<0.000000e+00> : vector<16xf32>
    %91 = vector.multi_reduction <add>, %90, %cst_44 [1] : vector<16x16xf32> to vector<16xf32>
    %92 = vector.shape_cast %91 : vector<16xf32> to vector<16x1xf32>
    %93 = vector.broadcast %92 : vector<16x1xf32> to vector<16x16xf32>
    %94 = arith.divf %90, %93 : vector<16x16xf32>
    %cst_45 = arith.constant dense<0.000000e+00> : vector<16x32xf32>
    %95 = tpu.matmul %94, %83, %cst_45 {dimension_numbers = #tpu.dot_dimension_numbers<[1], [0], [0], [1], [0, 0, 1, 1], [], []>} : vector<16x16xf32>, vector<16x32xf32>, vector<16x32xf32> -> vector<16x32xf32>
    %96 = vector.extract_strided_slice %49 {offsets = [0, 96], sizes = [16, 32], strides = [1, 1]} : vector<16x128xf32> to vector<16x32xf32>
    %97 = vector.extract_strided_slice %50 {offsets = [0, 96], sizes = [16, 32], strides = [1, 1]} : vector<16x256xf32> to vector<16x32xf32>
    %98 = vector.extract_strided_slice %50 {offsets = [0, 224], sizes = [16, 32], strides = [1, 1]} : vector<16x256xf32> to vector<16x32xf32>
    %cst_46 = arith.constant dense<0.000000e+00> : vector<16x16xf32>
    %99 = tpu.matmul %96, %97, %cst_46 {dimension_numbers = #tpu.dot_dimension_numbers<[1], [1], [0], [0], [0, 0, 1, 0], [], []>} : vector<16x32xf32>, vector<16x32xf32>, vector<16x16xf32> -> vector<16x16xf32>
    %100 = arith.addf %99, %13 : vector<16x16xf32>
    %cst_47 = arith.constant dense<0xFF800000> : vector<16xf32>
    %101 = vector.multi_reduction <maximumf>, %100, %cst_47 [1] : vector<16x16xf32> to vector<16xf32>
    %102 = vector.shape_cast %101 : vector<16xf32> to vector<16x1xf32>
    %103 = vector.broadcast %102 : vector<16x1xf32> to vector<16x16xf32>
    %104 = arith.subf %100, %103 : vector<16x16xf32>
    %105 = math.exp %104 : vector<16x16xf32>
    %cst_48 = arith.constant dense<0.000000e+00> : vector<16xf32>
    %106 = vector.multi_reduction <add>, %105, %cst_48 [1] : vector<16x16xf32> to vector<16xf32>
    %107 = vector.shape_cast %106 : vector<16xf32> to vector<16x1xf32>
    %108 = vector.broadcast %107 : vector<16x1xf32> to vector<16x16xf32>
    %109 = arith.divf %105, %108 : vector<16x16xf32>
    %cst_49 = arith.constant dense<0.000000e+00> : vector<16x32xf32>
    %110 = tpu.matmul %109, %98, %cst_49 {dimension_numbers = #tpu.dot_dimension_numbers<[1], [0], [0], [1], [0, 0, 1, 1], [], []>} : vector<16x16xf32>, vector<16x32xf32>, vector<16x32xf32> -> vector<16x32xf32>
    %111 = tpu.concatenate %65, %80, %95, %110 in 1 : vector<16x32xf32>, vector<16x32xf32>, vector<16x32xf32>, vector<16x32xf32> -> vector<16x128xf32>
    %112 = arith.truncf %111 : vector<16x128xf32> to vector<16x128xbf16>
    %cst_50 = arith.constant dense<0.000000e+00> : vector<16x128xf32>
    %113 = tpu.matmul %112, %5, %cst_50 {dimension_numbers = #tpu.dot_dimension_numbers<[1], [0], [0], [1], [0, 0, 1, 1], [], []>} : vector<16x128xbf16>, vector<128x128xbf16>, vector<16x128xf32> -> vector<16x128xf32>
    %114 = vector.broadcast %17 : vector<1x128xf32> to vector<16x128xf32>
    %115 = arith.addf %113, %114 : vector<16x128xf32>
    %116 = arith.addf %11, %115 : vector<16x128xf32>
    %cst_51 = arith.constant dense<0.000000e+00> : vector<16xf32>
    %117 = vector.multi_reduction <add>, %116, %cst_51 [1] : vector<16x128xf32> to vector<16xf32>
    %118 = vector.shape_cast %117 : vector<16xf32> to vector<16x1xf32>
    %cst_52 = arith.constant 1.280000e+02 : f32
    %119 = vector.broadcast %cst_52 : f32 to vector<16x1xf32>
    %120 = arith.divf %118, %119 : vector<16x1xf32>
    %121 = vector.broadcast %120 : vector<16x1xf32> to vector<16x128xf32>
    %122 = arith.subf %116, %121 : vector<16x128xf32>
    %123 = arith.mulf %122, %122 : vector<16x128xf32>
    %cst_53 = arith.constant dense<0.000000e+00> : vector<16xf32>
    %124 = vector.multi_reduction <add>, %123, %cst_53 [1] : vector<16x128xf32> to vector<16xf32>
    %125 = vector.shape_cast %124 : vector<16xf32> to vector<16x1xf32>
    %cst_54 = arith.constant 1.280000e+02 : f32
    %126 = vector.broadcast %cst_54 : f32 to vector<16x1xf32>
    %127 = arith.divf %125, %126 : vector<16x1xf32>
    %cst_55 = arith.constant 9.99999997E-7 : f32
    %128 = vector.broadcast %cst_55 : f32 to vector<16x1xf32>
    %129 = arith.addf %127, %128 : vector<16x1xf32>
    %130 = math.rsqrt %129 : vector<16x1xf32>
    %131 = vector.broadcast %130 : vector<16x1xf32> to vector<16x128xf32>
    %132 = arith.mulf %122, %131 : vector<16x128xf32>
    %133 = vector.broadcast %18 : vector<1x128xf32> to vector<16x128xf32>
    %134 = arith.mulf %132, %133 : vector<16x128xf32>
    %135 = vector.broadcast %19 : vector<1x128xf32> to vector<16x128xf32>
    %136 = arith.addf %134, %135 : vector<16x128xf32>
    %137 = arith.truncf %136 : vector<16x128xf32> to vector<16x128xbf16>
    %cst_56 = arith.constant dense<0.000000e+00> : vector<16x128xf32>
    %138 = tpu.matmul %137, %6, %cst_56 {dimension_numbers = #tpu.dot_dimension_numbers<[1], [0], [0], [1], [0, 0, 1, 1], [], []>} : vector<16x128xbf16>, vector<128x128xbf16>, vector<16x128xf32> -> vector<16x128xf32>
    %139 = vector.broadcast %20 : vector<1x128xf32> to vector<16x128xf32>
    %140 = arith.addf %138, %139 : vector<16x128xf32>
    %141 = arith.truncf %12 : vector<16x128xf32> to vector<16x128xbf16>
    %cst_57 = arith.constant dense<0.000000e+00> : vector<16x256xf32>
    %142 = tpu.matmul %141, %7, %cst_57 {dimension_numbers = #tpu.dot_dimension_numbers<[1], [0], [0], [1], [0, 0, 1, 1], [], []>} : vector<16x128xbf16>, vector<128x256xbf16>, vector<16x256xf32> -> vector<16x256xf32>
    %143 = vector.broadcast %2 : vector<1x256xf32> to vector<16x256xf32>
    %144 = arith.addf %142, %143 : vector<16x256xf32>
    %145 = vector.extract_strided_slice %140 {offsets = [0, 0], sizes = [16, 32], strides = [1, 1]} : vector<16x128xf32> to vector<16x32xf32>
    %146 = vector.extract_strided_slice %144 {offsets = [0, 0], sizes = [16, 32], strides = [1, 1]} : vector<16x256xf32> to vector<16x32xf32>
    %147 = vector.extract_strided_slice %144 {offsets = [0, 128], sizes = [16, 32], strides = [1, 1]} : vector<16x256xf32> to vector<16x32xf32>
    %cst_58 = arith.constant dense<0.000000e+00> : vector<16x16xf32>
    %148 = tpu.matmul %145, %146, %cst_58 {dimension_numbers = #tpu.dot_dimension_numbers<[1], [1], [0], [0], [0, 0, 1, 0], [], []>} : vector<16x32xf32>, vector<16x32xf32>, vector<16x16xf32> -> vector<16x16xf32>
    %149 = arith.addf %148, %14 : vector<16x16xf32>
    %cst_59 = arith.constant dense<0xFF800000> : vector<16xf32>
    %150 = vector.multi_reduction <maximumf>, %149, %cst_59 [1] : vector<16x16xf32> to vector<16xf32>
    %151 = vector.shape_cast %150 : vector<16xf32> to vector<16x1xf32>
    %152 = vector.broadcast %151 : vector<16x1xf32> to vector<16x16xf32>
    %153 = arith.subf %149, %152 : vector<16x16xf32>
    %154 = math.exp %153 : vector<16x16xf32>
    %cst_60 = arith.constant dense<0.000000e+00> : vector<16xf32>
    %155 = vector.multi_reduction <add>, %154, %cst_60 [1] : vector<16x16xf32> to vector<16xf32>
    %156 = vector.shape_cast %155 : vector<16xf32> to vector<16x1xf32>
    %157 = vector.broadcast %156 : vector<16x1xf32> to vector<16x16xf32>
    %158 = arith.divf %154, %157 : vector<16x16xf32>
    %cst_61 = arith.constant dense<0.000000e+00> : vector<16x32xf32>
    %159 = tpu.matmul %158, %147, %cst_61 {dimension_numbers = #tpu.dot_dimension_numbers<[1], [0], [0], [1], [0, 0, 1, 1], [], []>} : vector<16x16xf32>, vector<16x32xf32>, vector<16x32xf32> -> vector<16x32xf32>
    %160 = vector.extract_strided_slice %140 {offsets = [0, 32], sizes = [16, 32], strides = [1, 1]} : vector<16x128xf32> to vector<16x32xf32>
    %161 = vector.extract_strided_slice %144 {offsets = [0, 32], sizes = [16, 32], strides = [1, 1]} : vector<16x256xf32> to vector<16x32xf32>
    %162 = vector.extract_strided_slice %144 {offsets = [0, 160], sizes = [16, 32], strides = [1, 1]} : vector<16x256xf32> to vector<16x32xf32>
    %cst_62 = arith.constant dense<0.000000e+00> : vector<16x16xf32>
    %163 = tpu.matmul %160, %161, %cst_62 {dimension_numbers = #tpu.dot_dimension_numbers<[1], [1], [0], [0], [0, 0, 1, 0], [], []>} : vector<16x32xf32>, vector<16x32xf32>, vector<16x16xf32> -> vector<16x16xf32>
    %164 = arith.addf %163, %14 : vector<16x16xf32>
    %cst_63 = arith.constant dense<0xFF800000> : vector<16xf32>
    %165 = vector.multi_reduction <maximumf>, %164, %cst_63 [1] : vector<16x16xf32> to vector<16xf32>
    %166 = vector.shape_cast %165 : vector<16xf32> to vector<16x1xf32>
    %167 = vector.broadcast %166 : vector<16x1xf32> to vector<16x16xf32>
    %168 = arith.subf %164, %167 : vector<16x16xf32>
    %169 = math.exp %168 : vector<16x16xf32>
    %cst_64 = arith.constant dense<0.000000e+00> : vector<16xf32>
    %170 = vector.multi_reduction <add>, %169, %cst_64 [1] : vector<16x16xf32> to vector<16xf32>
    %171 = vector.shape_cast %170 : vector<16xf32> to vector<16x1xf32>
    %172 = vector.broadcast %171 : vector<16x1xf32> to vector<16x16xf32>
    %173 = arith.divf %169, %172 : vector<16x16xf32>
    %cst_65 = arith.constant dense<0.000000e+00> : vector<16x32xf32>
    %174 = tpu.matmul %173, %162, %cst_65 {dimension_numbers = #tpu.dot_dimension_numbers<[1], [0], [0], [1], [0, 0, 1, 1], [], []>} : vector<16x16xf32>, vector<16x32xf32>, vector<16x32xf32> -> vector<16x32xf32>
    %175 = vector.extract_strided_slice %140 {offsets = [0, 64], sizes = [16, 32], strides = [1, 1]} : vector<16x128xf32> to vector<16x32xf32>
    %176 = vector.extract_strided_slice %144 {offsets = [0, 64], sizes = [16, 32], strides = [1, 1]} : vector<16x256xf32> to vector<16x32xf32>
    %177 = vector.extract_strided_slice %144 {offsets = [0, 192], sizes = [16, 32], strides = [1, 1]} : vector<16x256xf32> to vector<16x32xf32>
    %cst_66 = arith.constant dense<0.000000e+00> : vector<16x16xf32>
    %178 = tpu.matmul %175, %176, %cst_66 {dimension_numbers = #tpu.dot_dimension_numbers<[1], [1], [0], [0], [0, 0, 1, 0], [], []>} : vector<16x32xf32>, vector<16x32xf32>, vector<16x16xf32> -> vector<16x16xf32>
    %179 = arith.addf %178, %14 : vector<16x16xf32>
    %cst_67 = arith.constant dense<0xFF800000> : vector<16xf32>
    %180 = vector.multi_reduction <maximumf>, %179, %cst_67 [1] : vector<16x16xf32> to vector<16xf32>
    %181 = vector.shape_cast %180 : vector<16xf32> to vector<16x1xf32>
    %182 = vector.broadcast %181 : vector<16x1xf32> to vector<16x16xf32>
    %183 = arith.subf %179, %182 : vector<16x16xf32>
    %184 = math.exp %183 : vector<16x16xf32>
    %cst_68 = arith.constant dense<0.000000e+00> : vector<16xf32>
    %185 = vector.multi_reduction <add>, %184, %cst_68 [1] : vector<16x16xf32> to vector<16xf32>
    %186 = vector.shape_cast %185 : vector<16xf32> to vector<16x1xf32>
    %187 = vector.broadcast %186 : vector<16x1xf32> to vector<16x16xf32>
    %188 = arith.divf %184, %187 : vector<16x16xf32>
    %cst_69 = arith.constant dense<0.000000e+00> : vector<16x32xf32>
    %189 = tpu.matmul %188, %177, %cst_69 {dimension_numbers = #tpu.dot_dimension_numbers<[1], [0], [0], [1], [0, 0, 1, 1], [], []>} : vector<16x16xf32>, vector<16x32xf32>, vector<16x32xf32> -> vector<16x32xf32>
    %190 = vector.extract_strided_slice %140 {offsets = [0, 96], sizes = [16, 32], strides = [1, 1]} : vector<16x128xf32> to vector<16x32xf32>
    %191 = vector.extract_strided_slice %144 {offsets = [0, 96], sizes = [16, 32], strides = [1, 1]} : vector<16x256xf32> to vector<16x32xf32>
    %192 = vector.extract_strided_slice %144 {offsets = [0, 224], sizes = [16, 32], strides = [1, 1]} : vector<16x256xf32> to vector<16x32xf32>
    %cst_70 = arith.constant dense<0.000000e+00> : vector<16x16xf32>
    %193 = tpu.matmul %190, %191, %cst_70 {dimension_numbers = #tpu.dot_dimension_numbers<[1], [1], [0], [0], [0, 0, 1, 0], [], []>} : vector<16x32xf32>, vector<16x32xf32>, vector<16x16xf32> -> vector<16x16xf32>
    %194 = arith.addf %193, %14 : vector<16x16xf32>
    %cst_71 = arith.constant dense<0xFF800000> : vector<16xf32>
    %195 = vector.multi_reduction <maximumf>, %194, %cst_71 [1] : vector<16x16xf32> to vector<16xf32>
    %196 = vector.shape_cast %195 : vector<16xf32> to vector<16x1xf32>
    %197 = vector.broadcast %196 : vector<16x1xf32> to vector<16x16xf32>
    %198 = arith.subf %194, %197 : vector<16x16xf32>
    %199 = math.exp %198 : vector<16x16xf32>
    %cst_72 = arith.constant dense<0.000000e+00> : vector<16xf32>
    %200 = vector.multi_reduction <add>, %199, %cst_72 [1] : vector<16x16xf32> to vector<16xf32>
    %201 = vector.shape_cast %200 : vector<16xf32> to vector<16x1xf32>
    %202 = vector.broadcast %201 : vector<16x1xf32> to vector<16x16xf32>
    %203 = arith.divf %199, %202 : vector<16x16xf32>
    %cst_73 = arith.constant dense<0.000000e+00> : vector<16x32xf32>
    %204 = tpu.matmul %203, %192, %cst_73 {dimension_numbers = #tpu.dot_dimension_numbers<[1], [0], [0], [1], [0, 0, 1, 1], [], []>} : vector<16x16xf32>, vector<16x32xf32>, vector<16x32xf32> -> vector<16x32xf32>
    %205 = tpu.concatenate %159, %174, %189, %204 in 1 : vector<16x32xf32>, vector<16x32xf32>, vector<16x32xf32>, vector<16x32xf32> -> vector<16x128xf32>
    %206 = arith.truncf %205 : vector<16x128xf32> to vector<16x128xbf16>
    %cst_74 = arith.constant dense<0.000000e+00> : vector<16x128xf32>
    %207 = tpu.matmul %206, %8, %cst_74 {dimension_numbers = #tpu.dot_dimension_numbers<[1], [0], [0], [1], [0, 0, 1, 1], [], []>} : vector<16x128xbf16>, vector<128x128xbf16>, vector<16x128xf32> -> vector<16x128xf32>
    %208 = vector.broadcast %21 : vector<1x128xf32> to vector<16x128xf32>
    %209 = arith.addf %207, %208 : vector<16x128xf32>
    %210 = arith.addf %116, %209 : vector<16x128xf32>
    %cst_75 = arith.constant dense<0.000000e+00> : vector<16xf32>
    %211 = vector.multi_reduction <add>, %210, %cst_75 [1] : vector<16x128xf32> to vector<16xf32>
    %212 = vector.shape_cast %211 : vector<16xf32> to vector<16x1xf32>
    %cst_76 = arith.constant 1.280000e+02 : f32
    %213 = vector.broadcast %cst_76 : f32 to vector<16x1xf32>
    %214 = arith.divf %212, %213 : vector<16x1xf32>
    %215 = vector.broadcast %214 : vector<16x1xf32> to vector<16x128xf32>
    %216 = arith.subf %210, %215 : vector<16x128xf32>
    %217 = arith.mulf %216, %216 : vector<16x128xf32>
    %cst_77 = arith.constant dense<0.000000e+00> : vector<16xf32>
    %218 = vector.multi_reduction <add>, %217, %cst_77 [1] : vector<16x128xf32> to vector<16xf32>
    %219 = vector.shape_cast %218 : vector<16xf32> to vector<16x1xf32>
    %cst_78 = arith.constant 1.280000e+02 : f32
    %220 = vector.broadcast %cst_78 : f32 to vector<16x1xf32>
    %221 = arith.divf %219, %220 : vector<16x1xf32>
    %cst_79 = arith.constant 9.99999997E-7 : f32
    %222 = vector.broadcast %cst_79 : f32 to vector<16x1xf32>
    %223 = arith.addf %221, %222 : vector<16x1xf32>
    %224 = math.rsqrt %223 : vector<16x1xf32>
    %225 = vector.broadcast %224 : vector<16x1xf32> to vector<16x128xf32>
    %226 = arith.mulf %216, %225 : vector<16x128xf32>
    %227 = vector.broadcast %22 : vector<1x128xf32> to vector<16x128xf32>
    %228 = arith.mulf %226, %227 : vector<16x128xf32>
    %229 = vector.broadcast %23 : vector<1x128xf32> to vector<16x128xf32>
    %230 = arith.addf %228, %229 : vector<16x128xf32>
    %231 = arith.truncf %230 : vector<16x128xf32> to vector<16x128xbf16>
    %cst_80 = arith.constant dense<0.000000e+00> : vector<16x512xf32>
    %232 = tpu.matmul %231, %9, %cst_80 {dimension_numbers = #tpu.dot_dimension_numbers<[1], [0], [0], [1], [0, 0, 1, 1], [], []>} : vector<16x128xbf16>, vector<128x512xbf16>, vector<16x512xf32> -> vector<16x512xf32>
    %233 = vector.broadcast %3 : vector<1x512xf32> to vector<16x512xf32>
    %234 = arith.addf %232, %233 : vector<16x512xf32>
    %cst_81 = arith.constant 0.000000e+00 : f32
    %235 = vector.broadcast %cst_81 : f32 to vector<16x512xf32>
    %236 = arith.maximumf %234, %235 : vector<16x512xf32>
    %237 = arith.truncf %236 : vector<16x512xf32> to vector<16x512xbf16>
    %cst_82 = arith.constant dense<0.000000e+00> : vector<16x128xf32>
    %238 = tpu.matmul %237, %10, %cst_82 {dimension_numbers = #tpu.dot_dimension_numbers<[1], [0], [0], [1], [0, 0, 1, 1], [], []>} : vector<16x512xbf16>, vector<512x128xbf16>, vector<16x128xf32> -> vector<16x128xf32>
    %239 = vector.broadcast %24 : vector<1x128xf32> to vector<16x128xf32>
    %240 = arith.addf %238, %239 : vector<16x128xf32>
    %241 = arith.addf %210, %240 : vector<16x128xf32>
    %c0_83 = arith.constant 0 : index
    %c0_84 = arith.constant 0 : index
    %242 = vector.load %arg15[%c0_83, %c0_84] : memref<16x128xf32, #tpu.memory_space<vmem>>, vector<16x128xf32>
    tpu.vector_store %arg15[%c0_83, %c0_84], %241 {strides = array<i32>} : memref<16x128xf32, #tpu.memory_space<vmem>>, vector<16x128xf32>,
    return
  }
}

</mosaic_0001>

<bundles_post_ra>
// kernel: tpu_custom_call.1
= control target key start
LH: loop header
LB: loop body
LE: loop exit
PB: predicated region body
PF: predicated region fallthrough
CT: control target
= control target key end

     0   :  { %20 = vsyncpa [#allocation3], 0  ;;  %s5336_s0 = inlined_call_operand.hbm [shape: f32[16,128], index: 0, kind: input, shape index: {}]   ;;  %s5337_s1 = inlined_call_operand.hbm [shape: f32[16,128], index: 1, kind: input, shape index: {}]   ;;  %s5338_s2 = inlined_call_operand.hbm [shape: f32[16,16], index: 2, kind: input, shape index: {}]   ;;  %s5339_s3 = inlined_call_operand.hbm [shape: f32[16,16], index: 3, kind: input, shape index: {}]   ;;  %s5340_s4 = inlined_call_operand.hbm [shape: f32[10,128], index: 4, kind: input, shape index: {}]   ;;  %s5341_s5 = inlined_call_operand.vmem [shape: f32[1,384], index: 5, kind: input, shape index: {}]   ;;  %s5342_s6 = inlined_call_operand.vmem [shape: f32[1,256], index: 6, kind: input, shape index: {}]   ;;  %s5343_s7 = inlined_call_operand.vmem [shape: f32[1,512], index: 7, kind: input, shape index: {}]   ;;  %s5344_s8 = inlined_call_operand.hbm [shape: bf16[128,384], index: 8, kind: input, shape index: {}]   ;;  %s5345_s9 = inlined_call_operand.hbm [shape: bf16[128,128], index: 9, kind: input, shape index: {}]   ;;  %s5346_s10 = inlined_call_operand.hbm [shape: bf16[128,128], index: 10, kind: input, shape index: {}]   ;;  %s5347_s11 = inlined_call_operand.hbm [shape: bf16[128,256], index: 11, kind: input, shape index: {}]   ;;  %s5348_s12 = inlined_call_operand.hbm [shape: bf16[128,128], index: 12, kind: input, shape index: {}]   ;;  %s5349_s13 = inlined_call_operand.hbm [shape: bf16[128,512], index: 13, kind: input, shape index: {}]   ;;  %s5350_s14 = inlined_call_operand.hbm [shape: bf16[512,128], index: 14, kind: input, shape index: {}]   ;;  %s5351_s15 = inlined_call_operand.hbm [shape: f32[16,128], index: 15, kind: output, shape index: {}]  }
   0x1   :  { %21 = vsyncpa [#allocation6], 0 }
   0x2   :  { %22 = vsyncpa [#allocation9], 0 }
   0x3   :  { %23 = vsyncpa [#allocation12], 0 }
   0x4   :  { %24 = vsyncpa [#allocation15], 0 }
   0x5   :  { %25 = vsyncpa [#allocation18], 0 }
   0x6   :  { %26 = vsyncpa [#allocation21], 0 }
   0x7   :  { %27 = vsyncpa [#allocation4], 0  ;;  %s4655_s18 = smov [#allocation5]   ;;  %s4656_s20 = smov [#allocation8]  }
   0x8   :  { %s45_s19 = sshll.u32 %s4655_s18, 4  ;;  %s69_s21 = sshll.u32 %s4656_s20, 4  ;;  %s46_s19 = int_to_ptr.vmem [resolvable:$true] %s45_s19  ;;  %s4761_s21 = int_to_ptr.vmem [resolvable:$true] %s69_s21 }
   0x9   :  { %s4353_s24 = scalar_lea.hbm %s5337_s1, 256 }
   0xa   :  { %p4354_p0 = scmp.ne.s32.totalorder %s5337_s1, %s4353_s24  ;;  %p4357_p1 = scmp.lt.u32.totalorder %s4353_s24, %s5337_s1 }
   0xc   :  { %p4359_p2 = pnand %p4357_p1, %p4354_p0 }
   0xe   :  { %4362 = shalt.err (!%p4359_p2)
}
   0xf   :  { %s4363_s29 = scalar_lea.vmem %s46_s19, 256  ;;  %p4368_p4 = scmp.lt.s32.totalorder %s46_s19, %s46_s19 }
  0x10   :  { %p4364_p3 = scmp.ne.s32.totalorder %s46_s19, %s4363_s29  ;;  %p4369_p5 = scmp.lt.s32.totalorder %s4363_s29, %s4363_s29 }
  0x12   :  { %p4370_p6 = por %p4369_p5, %p4368_p4 }
  0x14   :  { %p4371_p7 = pnand %p4370_p6, %p4364_p3 }
  0x16   :  { %4374 = shalt.err (!%p4371_p7)
}
  0x17   :  { %s5352_s30 = smov 128   ;;  %s4658_s16 = smov 8  }
  0x18   :  { %51 = dma.hbm_to_vmem [thread:$0]  %s5337_s1, 256, %s46_s19, [#allocation6], %s5352_s30, %s5352_s30, %s4658_s16  }
  0x19   :  { %s4375_s23 = scalar_lea.hbm %s5339_s3, 256 }
  0x1a   :  { %p4376_p8 = scmp.ne.s32.totalorder %s5339_s3, %s4375_s23  ;;  %p4379_p9 = scmp.lt.u32.totalorder %s4375_s23, %s5339_s3 }
  0x1c   :  { %p4381_p10 = pnand %p4379_p9, %p4376_p8 }
  0x1e   :  { %4384 = shalt.err (!%p4381_p10)
}
  0x1f   :  { %s4385_s28 = scalar_lea.vmem %s4761_s21, 256  ;;  %p4390_p12 = scmp.lt.s32.totalorder %s4761_s21, %s4761_s21 }
  0x20   :  { %p4386_p11 = scmp.ne.s32.totalorder %s4761_s21, %s4385_s28  ;;  %p4391_p13 = scmp.lt.s32.totalorder %s4385_s28, %s4385_s28 }
  0x22   :  { %p4392_p0 = por %p4391_p13, %p4390_p12 }
  0x24   :  { %p4393_p1 = pnand %p4392_p0, %p4386_p11 }
  0x26   :  { %4396 = shalt.err (!%p4393_p1)
}
  0x27   :  { %75 = dma.hbm_to_vmem [thread:$0]  %s5339_s3, 256, %s4761_s21, [#allocation9], %s5352_s30, %s5352_s30, %s4658_s16  }
  0x28   :  { %s4659_s29 = smov [#allocation11]   ;;  %s4397_s22 = scalar_lea.hbm %s5344_s8, 3072 }
  0x29   :  { %s99_s17 = sshll.u32 %s4659_s29, 4  ;;  %p4398_p2 = scmp.ne.s32.totalorder %s5344_s8, %s4397_s22  ;;  %s100_s17 = int_to_ptr.vmem [resolvable:$true] %s99_s17 }
  0x2a   :  { %p4401_p3 = scmp.lt.u32.totalorder %s4397_s22, %s5344_s8 }
  0x2c   :  { %p4403_p4 = pnand %p4401_p3, %p4398_p2 }
  0x2e   :  { %4406 = shalt.err (!%p4403_p4)
}
  0x2f   :  { %s4407_s27 = scalar_lea.vmem %s100_s17, 3072  ;;  %p4412_p6 = scmp.lt.s32.totalorder %s100_s17, %s100_s17 }
  0x30   :  { %p4408_p5 = scmp.ne.s32.totalorder %s100_s17, %s4407_s27  ;;  %p4413_p7 = scmp.lt.s32.totalorder %s4407_s27, %s4407_s27 }
  0x32   :  { %p4414_p8 = por %p4413_p7, %p4412_p6 }
  0x34   :  { %p4415_p9 = pnand %p4414_p8, %p4408_p5 }
  0x36   :  { %4418 = shalt.err (!%p4415_p9)
}
  0x37   :  { %s4660_s3 = smov 192   ;;  %s4661_s21 = smov 12  }
  0x38   :  { %105 = dma.hbm_to_vmem [thread:$0]  %s5344_s8, 3072, %s100_s17, [#allocation12], %s4660_s3, %s4660_s3, %s4661_s21  }
  0x39   :  { %s4662_s19 = smov [#allocation14]   ;;  %s4663_s18 = smov [#allocation17]  }
  0x3a   :  { %s123_s29 = sshll.u32 %s4662_s19, 4  ;;  %s147_s20 = sshll.u32 %s4663_s18, 4  ;;  %s124_s29 = int_to_ptr.vmem [resolvable:$true] %s123_s29  ;;  %s148_s20 = int_to_ptr.vmem [resolvable:$true] %s147_s20 }
  0x3b   :  { %s4419_s24 = scalar_lea.hbm %s5346_s10, 1024 }
  0x3c   :  { %p4420_p10 = scmp.ne.s32.totalorder %s5346_s10, %s4419_s24  ;;  %p4423_p11 = scmp.lt.u32.totalorder %s4419_s24, %s5346_s10 }
  0x3e   :  { %p4425_p12 = pnand %p4423_p11, %p4420_p10 }
  0x40   :  { %4428 = shalt.err (!%p4425_p12)
}
  0x41   :  { %s4429_s8 = scalar_lea.vmem %s124_s29, 1024  ;;  %p4434_p0 = scmp.lt.s32.totalorder %s124_s29, %s124_s29 }
  0x42   :  { %p4430_p13 = scmp.ne.s32.totalorder %s124_s29, %s4429_s8  ;;  %p4435_p1 = scmp.lt.s32.totalorder %s4429_s8, %s4429_s8 }
  0x44   :  { %p4436_p2 = por %p4435_p1, %p4434_p0 }
  0x46   :  { %p4437_p3 = pnand %p4436_p2, %p4430_p13 }
  0x48   :  { %4440 = shalt.err (!%p4437_p3)
}
  0x49   :  { %s4664_s17 = smov 64   ;;  %s4665_s3 = smov 4  }
  0x4a   :  { %129 = dma.hbm_to_vmem [thread:$0]  %s5346_s10, 1024, %s124_s29, [#allocation15], %s4664_s17, %s4664_s17, %s4665_s3  }
  0x4b   :  { %s4441_s19 = scalar_lea.hbm %s5348_s12, 1024 }
  0x4c   :  { %p4442_p4 = scmp.ne.s32.totalorder %s5348_s12, %s4441_s19  ;;  %p4445_p5 = scmp.lt.u32.totalorder %s4441_s19, %s5348_s12 }
  0x4e   :  { %p4447_p6 = pnand %p4445_p5, %p4442_p4 }
  0x50   :  { %4450 = shalt.err (!%p4447_p6)
}
  0x51   :  { %s4451_s25 = scalar_lea.vmem %s148_s20, 1024  ;;  %p4456_p8 = scmp.lt.s32.totalorder %s148_s20, %s148_s20 }
  0x52   :  { %p4452_p7 = scmp.ne.s32.totalorder %s148_s20, %s4451_s25  ;;  %p4457_p9 = scmp.lt.s32.totalorder %s4451_s25, %s4451_s25 }
  0x54   :  { %p4458_p10 = por %p4457_p9, %p4456_p8 }
  0x56   :  { %p4459_p11 = pnand %p4458_p10, %p4452_p7 }
  0x58   :  { %4462 = shalt.err (!%p4459_p11)
}
  0x59   :  { %153 = dma.hbm_to_vmem [thread:$0]  %s5348_s12, 1024, %s148_s20, [#allocation18], %s4664_s17, %s4664_s17, %s4665_s3  }
  0x5a   :  { %s4666_s26 = smov [#allocation2]   ;;  %s4667_s8 = smov [#allocation7]  }
  0x5b   :  { %s33_s27 = sshll.u32 %s4666_s26, 4  ;;  %s57_s21 = sshll.u32 %s4667_s8, 4  ;;  %s34_s27 = int_to_ptr.vmem [resolvable:$true] %s33_s27  ;;  %s58_s21 = int_to_ptr.vmem [resolvable:$true] %s57_s21 }
  0x5c   :  { %s4463_s1 = scalar_lea.hbm %s5336_s0, 256 }
  0x5d   :  { %p4464_p12 = scmp.ne.s32.totalorder %s5336_s0, %s4463_s1  ;;  %p4467_p13 = scmp.lt.u32.totalorder %s4463_s1, %s5336_s0 }
  0x5f   :  { %p4469_p0 = pnand %p4467_p13, %p4464_p12 }
  0x61   :  { %4472 = shalt.err (!%p4469_p0)
}
  0x62   :  { %s4473_s12 = scalar_lea.vmem %s34_s27, 256  ;;  %p4478_p2 = scmp.lt.s32.totalorder %s34_s27, %s34_s27 }
  0x63   :  { %p4474_p1 = scmp.ne.s32.totalorder %s34_s27, %s4473_s12  ;;  %p4479_p3 = scmp.lt.s32.totalorder %s4473_s12, %s4473_s12 }
  0x65   :  { %p4480_p4 = por %p4479_p3, %p4478_p2 }
  0x67   :  { %p4481_p5 = pnand %p4480_p4, %p4474_p1 }
  0x69   :  { %4484 = shalt.err (!%p4481_p5)
}
  0x6a   :  { %s5354_s20 = smov 128   ;;  %s4485_s26 = scalar_lea.hbm %s5338_s2, 256 }
  0x6b   :  { %39 = dma.hbm_to_vmem [thread:$0]  %s5336_s0, 256, %s34_s27, [#allocation3], %s5354_s20, %s5354_s20, %s4658_s16  }
  0x6c   :  { %p4486_p6 = scmp.ne.s32.totalorder %s5338_s2, %s4485_s26  ;;  %p4489_p7 = scmp.lt.u32.totalorder %s4485_s26, %s5338_s2 }
  0x6e   :  { %p4491_p8 = pnand %p4489_p7, %p4486_p6 }
  0x70   :  { %4494 = shalt.err (!%p4491_p8)
}
  0x71   :  { %s4495_s19 = scalar_lea.vmem %s58_s21, 256  ;;  %p4500_p10 = scmp.lt.s32.totalorder %s58_s21, %s58_s21 }
  0x72   :  { %p4496_p9 = scmp.ne.s32.totalorder %s58_s21, %s4495_s19  ;;  %p4501_p11 = scmp.lt.s32.totalorder %s4495_s19, %s4495_s19 }
  0x74   :  { %p4502_p12 = por %p4501_p11, %p4500_p10 }
  0x76   :  { %p4503_p13 = pnand %p4502_p12, %p4496_p9 }
  0x78   :  { %4506 = shalt.err (!%p4503_p13)
}
  0x79   :  { %63 = dma.hbm_to_vmem [thread:$0]  %s5338_s2, 256, %s58_s21, [#allocation6], %s5354_s20, %s5354_s20, %s4658_s16  }
  0x7a   :  { %s4668_s18 = smov [#allocation10]   ;;  %s4669_s23 = smov [#allocation13]  }
  0x7b   :  { %s81_s22 = sshll.u32 %s4668_s18, 4  ;;  %s111_s12 = sshll.u32 %s4669_s23, 4  ;;  %s82_s22 = int_to_ptr.vmem [resolvable:$true] %s81_s22  ;;  %s112_s12 = int_to_ptr.vmem [resolvable:$true] %s111_s12 }
  0x7c   :  { %s4507_s10 = scalar_lea.hbm %s5340_s4, 256 }
  0x7d   :  { %p4508_p0 = scmp.ne.s32.totalorder %s5340_s4, %s4507_s10  ;;  %p4511_p1 = scmp.lt.u32.totalorder %s4507_s10, %s5340_s4 }
  0x7f   :  { %p4513_p2 = pnand %p4511_p1, %p4508_p0 }
  0x81   :  { %4516 = shalt.err (!%p4513_p2)
}
  0x82   :  { %s4517_s2 = scalar_lea.vmem %s82_s22, 256  ;;  %p4522_p4 = scmp.lt.s32.totalorder %s82_s22, %s82_s22 }
  0x83   :  { %p4518_p3 = scmp.ne.s32.totalorder %s82_s22, %s4517_s2  ;;  %p4523_p5 = scmp.lt.s32.totalorder %s4517_s2, %s4517_s2 }
  0x85   :  { %p4524_p6 = por %p4523_p5, %p4522_p4 }
  0x87   :  { %p4525_p7 = pnand %p4524_p6, %p4518_p3 }
  0x89   :  { %4528 = shalt.err (!%p4525_p7)
}
  0x8a   :  { %87 = dma.hbm_to_vmem [thread:$0]  %s5340_s4, 256, %s82_s22, [#allocation9], %s5354_s20, %s5354_s20, %s4658_s16  }
  0x8b   :  { %s4529_s0 = scalar_lea.hbm %s5345_s9, 1024 }
  0x8c   :  { %p4530_p8 = scmp.ne.s32.totalorder %s5345_s9, %s4529_s0  ;;  %p4533_p9 = scmp.lt.u32.totalorder %s4529_s0, %s5345_s9 }
  0x8e   :  { %p4535_p10 = pnand %p4533_p9, %p4530_p8 }
  0x90   :  { %4538 = shalt.err (!%p4535_p10)
}
  0x91   :  { %s4539_s25 = scalar_lea.vmem %s112_s12, 1024  ;;  %p4544_p12 = scmp.lt.s32.totalorder %s112_s12, %s112_s12 }
  0x92   :  { %p4540_p11 = scmp.ne.s32.totalorder %s112_s12, %s4539_s25  ;;  %p4545_p13 = scmp.lt.s32.totalorder %s4539_s25, %s4539_s25 }
  0x94   :  { %p4546_p0 = por %p4545_p13, %p4544_p12 }
  0x96   :  { %p4547_p1 = pnand %p4546_p0, %p4540_p11 }
  0x98   :  { %4550 = shalt.err (!%p4547_p1)
}
  0x99   :  { %117 = dma.hbm_to_vmem [thread:$0]  %s5345_s9, 1024, %s112_s12, [#allocation12], %s4664_s17, %s4664_s17, %s4665_s3  }
  0x9a   :  { %s4670_s10 = smov [#allocation16]   ;;  %s4671_s26 = smov [#allocation19]  }
  0x9b   :  { %s135_s29 = sshll.u32 %s4670_s10, 4  ;;  %s159_s8 = sshll.u32 %s4671_s26, 4  ;;  %s136_s29 = int_to_ptr.vmem [resolvable:$true] %s135_s29  ;;  %s160_s8 = int_to_ptr.vmem [resolvable:$true] %s159_s8 }
  0x9c   :  { %s4551_s21 = scalar_lea.hbm %s5347_s11, 2048 }
  0x9d   :  { %p4552_p2 = scmp.ne.s32.totalorder %s5347_s11, %s4551_s21  ;;  %p4555_p3 = scmp.lt.u32.totalorder %s4551_s21, %s5347_s11 }
  0x9f   :  { %p4557_p4 = pnand %p4555_p3, %p4552_p2 }
  0xa1   :  { %4560 = shalt.err (!%p4557_p4)
}
  0xa2   :  { %s4561_s9 = scalar_lea.vmem %s136_s29, 2048  ;;  %p4566_p6 = scmp.lt.s32.totalorder %s136_s29, %s136_s29 }
  0xa3   :  { %p4562_p5 = scmp.ne.s32.totalorder %s136_s29, %s4561_s9  ;;  %p4567_p7 = scmp.lt.s32.totalorder %s4561_s9, %s4561_s9 }
  0xa5   :  { %p4568_p8 = por %p4567_p7, %p4566_p6 }
  0xa7   :  { %p4569_p9 = pnand %p4568_p8, %p4562_p5 }
  0xa9   :  { %4572 = shalt.err (!%p4569_p9)
}
  0xaa   :  { %141 = dma.hbm_to_vmem [thread:$0]  %s5347_s11, 2048, %s136_s29, [#allocation15], %s5354_s20, %s5354_s20, %s4658_s16  }
  0xab   :  { %s4573_s24 = scalar_lea.hbm %s5349_s13, 4096 }
  0xac   :  { %p4574_p10 = scmp.ne.s32.totalorder %s5349_s13, %s4573_s24  ;;  %p4577_p11 = scmp.lt.u32.totalorder %s4573_s24, %s5349_s13 }
  0xae   :  { %p4579_p12 = pnand %p4577_p11, %p4574_p10 }
  0xb0   :  { %4582 = shalt.err (!%p4579_p12)
}
  0xb1   :  { %s4583_s26 = scalar_lea.vmem %s160_s8, 4096  ;;  %p4588_p0 = scmp.lt.s32.totalorder %s160_s8, %s160_s8 }
  0xb2   :  { %p4584_p13 = scmp.ne.s32.totalorder %s160_s8, %s4583_s26  ;;  %p4589_p1 = scmp.lt.s32.totalorder %s4583_s26, %s4583_s26 }
  0xb4   :  { %p4590_p2 = por %p4589_p1, %p4588_p0 }
  0xb6   :  { %p4591_p3 = pnand %p4590_p2, %p4584_p13 }
  0xb8   :  { %4594 = shalt.err (!%p4591_p3)
}
  0xb9   :  { %s4672_s11 = smov 256   ;;  %s4673_s29 = smov 16  }
  0xba   :  { %165 = dma.hbm_to_vmem [thread:$0]  %s5349_s13, 4096, %s160_s8, [#allocation18], %s4672_s11, %s4672_s11, %s4673_s29  }
  0xbb   :  { %s4674_s21 = smov [#allocation20]   ;;  %s4595_s0 = scalar_lea.hbm %s5350_s14, 4096 }
  0xbc   :  { %s171_s30 = sshll.u32 %s4674_s21, 4  ;;  %p4596_p4 = scmp.ne.s32.totalorder %s5350_s14, %s4595_s0  ;;  %s172_s30 = int_to_ptr.vmem [resolvable:$true] %s171_s30 }
  0xbd   :  { %p4599_p5 = scmp.lt.u32.totalorder %s4595_s0, %s5350_s14 }
  0xbf   :  { %p4601_p6 = pnand %p4599_p5, %p4596_p4 }
  0xc1   :  { %4604 = shalt.err (!%p4601_p6)
}
  0xc2   :  { %s4605_s23 = scalar_lea.vmem %s172_s30, 4096  ;;  %p4610_p8 = scmp.lt.s32.totalorder %s172_s30, %s172_s30 }
  0xc3   :  { %p4606_p7 = scmp.ne.s32.totalorder %s172_s30, %s4605_s23  ;;  %p4611_p9 = scmp.lt.s32.totalorder %s4605_s23, %s4605_s23 }
  0xc5   :  { %p4612_p10 = por %p4611_p9, %p4610_p8 }
  0xc7   :  { %p4613_p11 = pnand %p4612_p10, %p4606_p7 }
  0xc9   :  { %4616 = shalt.err (!%p4613_p11)
}
  0xca   :  { %177 = dma.hbm_to_vmem [thread:$0]  %s5350_s14, 4096, %s172_s30, [#allocation21], %s4664_s17, %s4664_s17, %s4665_s3  }
  0xcb   :  { %4639 = dma.done.wait [#allocation3], 256  }
  0xcc   :  { %4640 = vsyncadd [#allocation3], 4294967040 }
  0xcd   :  { %4641 = dma.done.wait [#allocation6], 512  }
  0xce   :  { %4642 = vsyncadd [#allocation6], 4294966784 }
  0xcf   :  { %4643 = dma.done.wait [#allocation9], 512  }
  0xd0   :  { %4644 = vsyncadd [#allocation9], 4294966784 }
  0xd1   :  { %4645 = dma.done.wait [#allocation12], 4096  }
  0xd2   :  { %4646 = vsyncadd [#allocation12], 4294963200 }
  0xd3   :  { %4647 = dma.done.wait [#allocation15], 3072  }
  0xd4   :  { %4648 = vsyncadd [#allocation15], 4294964224 }
  0xd5   :  { %4649 = dma.done.wait [#allocation18], 5120  }
  0xd6   :  { %4650 = vsyncadd [#allocation18], 4294962176 }
  0xd7   :  { %4651 = dma.done.wait [#allocation21], 4096  }
  0xd8   :  { %4652 = vsyncadd [#allocation21], 4294963200  ;;  %v412_v0 = vld [vmem:[#allocation2] sm:$0xff]  ;;  %v413_v1 = vld [vmem:[#allocation2 + $0x8] sm:$0xff]  ;;  %v4675_v4 = vmov 0.0   ;;  %v4676_v30 = vmov 0   ;;  %v443_v40 = vlaneseq }
  0xd9   :  { %420 = vadd.xlane.f32.xlu0 %v412_v0  ;;  %v4114_v2 = vld [vmem:[#allocation11 + $0x4] ss:$12 sps:$4 sm:$0xff]   ;;  %v4116_v3 = vld [vmem:[#allocation11] ss:$12 sps:$4 sm:$0xff]   ;;  %3726 = vmatprep.subr.bf16.mxu1 %v4675_v4  ;;  %v4117_v5 = vld [vmem:[#allocation11 + $0x8] ss:$12 sps:$4 sm:$0xff]  }
  0xda   :  { %600 = vmatprep.subr.bf16.mxu0 %v4114_v2  ;;  %3727 = vmatpush3.bf16.msra.mxu1 %v4117_v5  ;;  %v4118_v14 = vld [vmem:[#allocation11 + $0x1c] ss:$12 sps:$4 sm:$0xff]   ;;  %v4120_v15 = vld [vmem:[#allocation11 + $0x18] ss:$12 sps:$4 sm:$0xff]   ;;  %v4121_v16 = vld [vmem:[#allocation11 + $0x20] ss:$12 sps:$4 sm:$0xff]  }
  0xdb   :  { %601 = vmatpush1.bf16.msra.mxu0 %v4116_v3  ;;  %3728 = vmatprep.subr.bf16.mxu1 %v4675_v4  ;;  %v4122_v17 = vld [vmem:[#allocation11 + $0x34] ss:$12 sps:$4 sm:$0xff]   ;;  %v4124_v18 = vld [vmem:[#allocation11 + $0x30] ss:$12 sps:$4 sm:$0xff]   ;;  %v4125_v19 = vld [vmem:[#allocation11 + $0x38] ss:$12 sps:$4 sm:$0xff]  }
  0xdc   :  { %602 = vmatprep.subr.bf16.mxu0 %v4118_v14  ;;  %v4126_v20 = vld [vmem:[#allocation11 + $0x4c] ss:$12 sps:$4 sm:$0xff]   ;;  %v4128_v21 = vld [vmem:[#allocation11 + $0x48] ss:$12 sps:$4 sm:$0xff]   ;;  %v4129_v22 = vld [vmem:[#allocation11 + $0x50] ss:$12 sps:$4 sm:$0xff]   ;;  %632 = vmatprep.mubr.bf16.mxu0 %v4676_v30 }
  0xdd   :  { %422 = vadd.xlane.f32.xlu0 %v413_v1  ;;  %v4130_v23 = vld [vmem:[#allocation11 + $0x64] ss:$12 sps:$4 sm:$0xff]   ;;  %v4132_v24 = vld [vmem:[#allocation11 + $0x60] ss:$12 sps:$4 sm:$0xff]   ;;  %v4133_v25 = vld [vmem:[#allocation11 + $0x68] ss:$12 sps:$4 sm:$0xff]  }
  0xde   :  { %3729 = vmatpush3.bf16.msra.mxu1 %v4121_v16  ;;  %v4134_v26 = vld [vmem:[#allocation11 + $0x7c] ss:$12 sps:$4 sm:$0xff]   ;;  %v4136_v27 = vld [vmem:[#allocation11 + $0x78] ss:$12 sps:$4 sm:$0xff]   ;;  %v4137_v28 = vld [vmem:[#allocation11 + $0x80] ss:$12 sps:$4 sm:$0xff]  }
  0xdf   :  { %603 = vmatpush1.bf16.msra.mxu0 %v4120_v15  ;;  %3730 = vmatprep.subr.bf16.mxu1 %v4675_v4  ;;  %v4138_v29 = vld [vmem:[#allocation11 + $0x94] ss:$12 sps:$4 sm:$0xff]   ;;  %vm4677_vm0 = vmmov 0   ;;  %v4140_v31 = vld [vmem:[#allocation11 + $0x90] ss:$12 sps:$4 sm:$0xff]   ;;  %v4961_v43 = vshrl.u32 %v443_v40, 7 }
  0xe0   :  { %604 = vmatprep.subr.bf16.mxu0 %v4122_v17  ;;  %3742 = vmatprep.mubr.msk.bf16.mxu1 %vm4677_vm0, %v4675_v4  ;;  %v4141_v32 = vld [vmem:[#allocation11 + $0x98] ss:$12 sps:$4 sm:$0xff]   ;;  %v4144_v34 = vld [vmem:[#allocation11 + $0xa8] ss:$12 sps:$4 sm:$0xff]   ;;  %v4145_v35 = vld [vmem:[#allocation11 + $0xb0] ss:$12 sps:$4 sm:$0xff]  }
  0xe1   :  { %v4142_v33 = vld [vmem:[#allocation11 + $0xac] ss:$12 sps:$4 sm:$0xff]   ;;  %v4964_v44 = vsub.s32 0, %v4961_v43  ;;  %v4966_v45 = vld [vmem:[#allocation10] sm:$0xff]  ;;  %v4972_v49 = vsub.s32 1, %v4961_v43  ;;  %v4981_v59 = vsub.s32 2, %v4961_v43 }
  0xe2   :  { %3731 = vmatpush3.bf16.msra.mxu1 %v4125_v19  ;;  %v217_v58 = vld [vmem:[%s5341_s5] sm:$0x7]  ;;  %vm684_vm1 = vcmask 261120   ;;  %v5008_v19 = vld [vmem:[#allocation7 + $0x8] sm:$0xff]  ;;  %vm772_vm3 = vcmask 130048   ;;  %s4678_s5 = smov 96  }
  0xe3   :  { %605 = vmatpush1.bf16.msra.mxu0 %v4124_v18  ;;  %3732 = vmatprep.subr.bf16.mxu1 %v4675_v4  ;;  %v446_v48 = vrot.slane %v4966_v45, %v4964_v44  ;;  %v452_v53 = vrot.slane %v4966_v45, %v4972_v49  ;;  %v460_v60 = vrot.slane %v217_v58, %v4964_v44  ;;  %vm4992_vm2 = vmpackc.low %vm684_vm1, %vm684_vm1  ;;  %s4679_s24 = smov 32   ;;  %vm1504_vm4 = vcmask 523264  }
  0xe4   :  { %606 = vmatprep.subr.bf16.mxu0 %v4126_v20  ;;  %v468_v61 = vrot.slane %v217_v58, %v4981_v59  ;;  %v5010_v20 = vld [vmem:[#allocation7] sm:$0xff]  ;;  %vm1507_vm5 = vcmask 785408  }
  0xe6   :  { %3733 = vmatpush3.bf16.msra.mxu1 %v4129_v22 }
  0xe7   :  { %607 = vmatpush1.bf16.msra.mxu0 %v4128_v21  ;;  %3734 = vmatprep.subr.bf16.mxu1 %v4675_v4 }
  0xe8   :  { %608 = vmatprep.subr.bf16.mxu0 %v4130_v23 }
  0xea   :  { %3735 = vmatpush3.bf16.msra.mxu1 %v4133_v25 }
  0xeb   :  { %609 = vmatpush1.bf16.msra.mxu0 %v4132_v24  ;;  %3736 = vmatprep.subr.bf16.mxu1 %v4675_v4 }
  0xec   :  { %610 = vmatprep.subr.bf16.mxu0 %v4134_v26 }
  0xee   :  { %3737 = vmatpush3.bf16.msra.mxu1 %v4137_v28 }
  0xef   :  { %611 = vmatpush1.bf16.msra.mxu0 %v4136_v27  ;;  %3738 = vmatprep.subr.bf16.mxu1 %v4675_v4 }
  0xf0   :  { %612 = vmatprep.subr.bf16.mxu0 %v4138_v29 }
  0xf2   :  { %3739 = vmatpush3.bf16.msra.mxu1 %v4141_v32 }
  0xf3   :  { %613 = vmatpush1.bf16.msra.mxu0 %v4140_v31  ;;  %3740 = vmatprep.subr.bf16.mxu1 %v4675_v4 }
  0xf4   :  { %614 = vmatprep.subr.bf16.mxu0 %v4142_v33 }
  0xf6   :  { %3741 = vmatpush3.bf16.msra.mxu1 %v4145_v35 }
  0xf7   :  { %615 = vmatpush1.bf16.msra.mxu0 %v4144_v34 }
 0x166   :  { %v421_v6 = vpop.xlane.xlu0 %420 }
 0x167   :  { %v425_v7 = vmul.f32 0.0078125, %v421_v6 }
 0x169   :  { %v4944_v8 = vsub.f32 %v412_v0, %v425_v7  ;;  %v464_v0 = vrot.slane %v217_v58, %v4972_v49 }
 0x16a   :  { %v423_v9 = vpop.xlane.xlu0 %422 }
 0x16b   :  { %v426_v10 = vmul.f32 0.0078125, %v423_v9  ;;  %v429_v11 = vmul.f32 %v4944_v8, %v4944_v8 }
 0x16d   :  { %v4948_v12 = vsub.f32 %v413_v1, %v426_v10  ;;  %431 = vadd.xlane.f32.xlu1 %v429_v11 }
 0x16f   :  { %v430_v13 = vmul.f32 %v4948_v12, %v4948_v12 }
 0x171   :  { %433 = vadd.xlane.f32.xlu1 %v430_v13 }
 0x1fa   :  { %v432_v36 = vpop.xlane.xlu1 %431 }
 0x1fb   :  { %v435_v37 = vmul.f32 0.0078125, %v432_v36 }
 0x1fd   :  { %v437_v38 = vadd.f32 1e-06, %v435_v37 }
 0x1fe   :  { %v434_v39 = vpop.xlane.xlu1 %433 }
 0x1ff   :  { %4274 = vrsqrt.f32 %v437_v38  ;;  %v436_v41 = vmul.f32 0.0078125, %v434_v39 }
 0x201   :  { %v438_v42 = vadd.f32 1e-06, %v436_v41 }
 0x203   :  { %4276 = vrsqrt.f32 %v438_v42 }
 0x209   :  { %v4275_v46 = vpop.eup %4274 }
 0x20a   :  { %v441_v47 = vmul.f32 %v4275_v46, %v4944_v8 }
 0x20c   :  { %v447_v52 = vmul.f32 %v446_v48, %v441_v47 }
 0x20d   :  { %v4277_v50 = vpop.eup %4276 }
 0x20e   :  { %v442_v51 = vmul.f32 %v4277_v50, %v4948_v12  ;;  %v453_v55 = vadd.f32 %v452_v53, %v447_v52 }
 0x210   :  { %v448_v54 = vmul.f32 %v446_v48, %v442_v51 }
 0x212   :  { %v454_v56 = vadd.f32 %v452_v53, %v448_v54 }
 0x214   :  { %v455_v57 = vpack.c.bf16 %v454_v56, %v453_v55 }
 0x216   :  { %633 = vmatmul.mubr.bf16.vlgmr.msra.gmra.mrb[0].mxu0 %v455_v57  ;;  %3743 = vmatmul.mubr.bf16.vlgmr.msra.gmra.mrb[0].mxu1 %v455_v57 }
 0x2e9   :  { %v634_v62 = vpop.f32.mrb[0].mxu0  ;;  %v677_v63 = vpop.f32.mrb[0].mxu1 }
 0x2ea   :  { %v4986_v1 = vadd.f32 %v634_v62, %v460_v60  ;;  %v636_v2 = vpop.f32.mrb[1].mxu0  ;;  %v3744_v3 = vpop.f32.mrb[1].mxu1  ;;  %v678_v7 = vadd.f32 %v677_v63, %v468_v61 }
 0x2eb   :  { %v638_v5 = vpop.f32.mrb[2].mxu0  ;;  %v680_v6 = vpop.f32.mrb[2].mxu1  ;;  %v637_v11 = vadd.f32 %v636_v2, %v464_v0 }
 0x2ec   :  { %v681_v8 = vadd.f32 %v680_v6, %v468_v61  ;;  %v640_v9 = vpop.f32.mrb[3].mxu0  ;;  %v3745_v10 = vpop.f32.mrb[3].mxu1  ;;  %3750 = vmatprep.mubr.msk.f32.mxu0 %vm684_vm1, %v4986_v1  ;;  %v5004_v18 = vadd.f32 %v638_v5, %v460_v60 }
 0x2ed   :  { %v641_v12 = vadd.f32 %v640_v9, %v464_v0 }
 0x2ee   :  { %v3924_v14 = vpack.c.bf16 %v681_v8, %v678_v7  ;;  %v4996_v15 = vpack.i.bf16 %v681_v8, %v678_v7 }
 0x2ef   :  { %v3918_v16 = vpack.c.bf16 %v641_v12, %v637_v11  ;;  %v4998_v17 = vpack.i.bf16 %v641_v12, %v637_v11 }
 0x2f1   :  { %3920 = vmatprep.subr.msk.bf16.mxu0 %vm4992_vm2, %v3918_v16 }
 0x2f2   :  { %3923 = vmatpush3.bf16.xpose.msk.msra.mxu0 %vm4992_vm2, %v3918_v16 }
 0x2f3   :  { %3925 = vmatprep.subr.bf16.mxu0 %v3924_v14 }
 0x2f9   :  { %3751 = vmatmul.mubr.msk.f32.vlgmr.msra.gmra.mrb[4].mxu0 %vm684_vm1, %v5004_v18 }
 0x2fa   :  { %3927 = vmatpush3.bf16.msra.mxu0 %v3924_v14 }
 0x3cc   :  { %v3752_v21 = vpop.f32.mrb[4].mxu0 }
 0x3cd   :  { %v769_v22 = vadd.f32 %v3752_v21, %v5008_v19  ;;  %v763_v23 = vpop.f32.mrb[5].mxu0 }
 0x3ce   :  { %v764_v24 = vadd.f32 %v763_v23, %v5010_v20 }
 0x3cf   :  { %v776_v25 = vsel %vm772_vm3, %v769_v22, -inf }
 0x3d0   :  { %777 = vmax.xlane.f32.xlu1 %v776_v25  ;;  %v773_v26 = vsel %vm772_vm3, %v764_v24, -inf }
 0x3d1   :  { %774 = vmax.xlane.f32.xlu0 %v773_v26 }
 0x45d   :  { %v778_v27 = vpop.xlane.xlu1 %777 }
 0x45e   :  { %v780_v28 = vsub.f32 %v769_v22, %v778_v27  ;;  %v775_v29 = vpop.xlane.xlu0 %774 }
 0x45f   :  { %v779_v31 = vsub.f32 %v764_v24, %v775_v29 }
 0x460   :  { %v783_v32 = vmul.f32 1.442695, %v780_v28 }
 0x461   :  { %v781_v33 = vmul.f32 1.442695, %v779_v31 }
 0x462   :  { %4278 = vpow2.f32 %v783_v32 }
 0x463   :  { %4280 = vpow2.f32 %v781_v33 }
 0x46c   :  { %v4279_v34 = vpop.eup %4278 }
 0x46d   :  { %v4281_v35 = vpop.eup %4280  ;;  %v788_v36 = vsel %vm772_vm3, %v4279_v34, 0.0 }
 0x46e   :  { %789 = vadd.xlane.f32.xlu1 %v788_v36  ;;  %v785_v37 = vsel %vm772_vm3, %v4281_v35, 0.0 }
 0x46f   :  { %786 = vadd.xlane.f32.xlu0 %v785_v37 }
 0x47f   :  { %4030 = vrot.lane.b32.xlu1 %v4998_v17, %s4664_s17 }
 0x483   :  { %876 = vrot.lane.b32.xlu1 %v4986_v1, %s4678_s5 }
 0x485   :  { %4025 = vrot.lane.b32.xlu0 %v4998_v17, %s4678_s5 }
 0x487   :  { %878 = vrot.lane.b32.xlu1 %v5004_v18, %s4678_s5 }
 0x489   :  { %1078 = vrot.lane.b32.xlu0 %v4986_v1, %s4664_s17 }
 0x48b   :  { %1080 = vrot.lane.b32.xlu1 %v5004_v18, %s4664_s17 }
 0x4fb   :  { %v790_v38 = vpop.xlane.xlu1 %789 }
 0x4fc   :  { %4282 = vrcp.f32 %v790_v38  ;;  %v787_v39 = vpop.xlane.xlu0 %786 }
 0x4fd   :  { %4284 = vrcp.f32 %v787_v39 }
 0x4ff   :  { %v4031_v47 = vpop.permute.xlu1 %4030 }
 0x500   :  { %v4026_v40 = vpop.permute.xlu0 %4025  ;;  %v4033_v51 = vunpack.i.h.bf16 %v4031_v47  ;;  %v4032_v52 = vunpack.i.l.bf16 %v4031_v47 }
 0x501   :  { %v4028_v41 = vunpack.i.h.bf16 %v4026_v40  ;;  %v4027_v42 = vunpack.i.l.bf16 %v4026_v40 }
 0x502   :  { %v3938_v55 = vpack.c.bf16 %v4033_v51, %v4032_v52 }
 0x503   :  { %v3928_v46 = vpack.c.bf16 %v4028_v41, %v4027_v42  ;;  %v877_v56 = vpop.permute.xlu1 %876 }
 0x504   :  { %v1079_v58 = vpop.permute.xlu0 %1078 }
 0x505   :  { %3930 = vmatprep.subr.msk.bf16.mxu0 %vm4992_vm2, %v3928_v46 }
 0x506   :  { %v4283_v48 = vpop.eup %4282 }
 0x507   :  { %v4285_v50 = vpop.eup %4284  ;;  %v794_v54 = vmul.f32 %v4283_v48, %v4279_v34  ;;  %v879_v57 = vpop.permute.xlu1 %878 }
 0x508   :  { %v792_v53 = vmul.f32 %v4285_v50, %v4281_v35 }
 0x50a   :  { %3757 = vmatprep.mubr.msk.f32.mxu0 %vm772_vm3, %v792_v53 }
 0x50b   :  { %3758 = vmatmul.mubr.msk.f32.vlgmr.msra.gmra.mrb[6].mxu0 %vm772_vm3, %v794_v54  ;;  %v1081_v60 = vpop.permute.xlu1 %1080 }
 0x50c   :  { %3933 = vmatpush3.bf16.xpose.msk.msra.mxu0 %vm4992_vm2, %v3928_v46  ;;  %3764 = vmatprep.mubr.msk.f32.mxu0 %vm684_vm1, %v877_v56 }
 0x50d   :  { %3940 = vmatprep.subr.msk.bf16.mxu0 %vm4992_vm2, %v3938_v55 }
 0x513   :  { %3765 = vmatmul.mubr.msk.f32.vlgmr.msra.gmra.mrb[8].mxu0 %vm684_vm1, %v879_v57 }
 0x514   :  { %3943 = vmatpush3.bf16.xpose.msk.msra.mxu0 %vm4992_vm2, %v3938_v55  ;;  %3778 = vmatprep.mubr.msk.f32.mxu0 %vm684_vm1, %v1079_v58 }
 0x51b   :  { %3779 = vmatmul.mubr.msk.f32.vlgmr.msra.gmra.mrb[10].mxu0 %vm684_vm1, %v1081_v60 }
 0x5de   :  { %v5044_v61 = vpop.f32.mrb[6].mxu0 }
 0x5df   :  { %v5046_v62 = vpop.f32.mrb[7].mxu0 }
 0x5e6   :  { %v3766_v63 = vpop.f32.mrb[8].mxu0 }
 0x5e7   :  { %v958_v0 = vpop.f32.mrb[9].mxu0  ;;  %v964_v9 = vadd.f32 %v3766_v63, %v5008_v19 }
 0x5e8   :  { %v959_v31 = vadd.f32 %v958_v0, %v5010_v20 }
 0x5e9   :  { %v970_v10 = vsel %vm772_vm3, %v964_v9, -inf }
 0x5ea   :  { %v967_v32 = vsel %vm772_vm3, %v959_v31, -inf }
 0x5ee   :  { %v3780_v2 = vpop.f32.mrb[10].mxu0 }
 0x5ef   :  { %v1166_v3 = vadd.f32 %v3780_v2, %v5008_v19  ;;  %v1160_v5 = vpop.f32.mrb[11].mxu0 }
 0x5f0   :  { %v1161_v6 = vadd.f32 %v1160_v5, %v5010_v20 }
 0x5f1   :  { %v1172_v7 = vsel %vm772_vm3, %v1166_v3, -inf }
 0x5f2   :  { %1173 = vmax.xlane.f32.xlu1 %v1172_v7  ;;  %v1169_v8 = vsel %vm772_vm3, %v1161_v6, -inf }
 0x5f3   :  { %1170 = vmax.xlane.f32.xlu0 %v1169_v8 }
 0x603   :  { %4040 = vrot.lane.b32.xlu1 %v4998_v17, %s4679_s24 }
 0x607   :  { %1278 = vrot.lane.b32.xlu1 %v4986_v1, %s4679_s24 }
 0x60b   :  { %1280 = vrot.lane.b32.xlu1 %v5004_v18, %s4679_s24 }
 0x62f   :  { %971 = vmax.xlane.f32.xlu1 %v970_v10 }
 0x67f   :  { %v1174_v11 = vpop.xlane.xlu1 %1173 }
 0x680   :  { %v1176_v12 = vsub.f32 %v1166_v3, %v1174_v11  ;;  %v1171_v14 = vpop.xlane.xlu0 %1170 }
 0x681   :  { %v1175_v16 = vsub.f32 %v1161_v6, %v1171_v14 }
 0x682   :  { %v1179_v21 = vmul.f32 1.442695, %v1176_v12 }
 0x683   :  { %v1177_v22 = vmul.f32 1.442695, %v1175_v16  ;;  %v4041_v24 = vpop.permute.xlu1 %4040 }
 0x684   :  { %4286 = vpow2.f32 %v1179_v21  ;;  %v4043_v38 = vunpack.i.h.bf16 %v4041_v24  ;;  %v4042_v39 = vunpack.i.l.bf16 %v4041_v24 }
 0x685   :  { %4288 = vpow2.f32 %v1177_v22 }
 0x686   :  { %v3948_v46 = vpack.c.bf16 %v4043_v38, %v4042_v39  ;;  %v4146_v39 = vld [vmem:[#allocation13] sm:$0xff]  }
 0x687   :  { %v1279_v25 = vpop.permute.xlu1 %1278 }
 0x68b   :  { %v1281_v26 = vpop.permute.xlu1 %1280 }
 0x68e   :  { %v4287_v17 = vpop.eup %4286 }
 0x68f   :  { %v1184_v23 = vsel %vm772_vm3, %v4287_v17, 0.0  ;;  %v4289_v1 = vpop.eup %4288 }
 0x690   :  { %1185 = vadd.xlane.f32.xlu0 %v1184_v23  ;;  %v1181_v18 = vsel %vm772_vm3, %v4289_v1, 0.0 }
 0x694   :  { %1182 = vadd.xlane.f32.xlu0 %v1181_v18 }
 0x6aa   :  { %4035 = vrot.lane.b32.xlu0 %v4996_v15, %s4664_s17 }
 0x6bc   :  { %v972_v27 = vpop.xlane.xlu1 %971 }
 0x6bd   :  { %v974_v28 = vsub.f32 %v964_v9, %v972_v27 }
 0x6bf   :  { %v977_v29 = vmul.f32 1.442695, %v974_v28 }
 0x6c1   :  { %4290 = vpow2.f32 %v977_v29 }
 0x6c9   :  { %968 = vmax.xlane.f32.xlu0 %v967_v32 }
 0x6cb   :  { %v5066_v33 = vpop.eup %4290 }
 0x6cc   :  { %v982_v34 = vsel %vm772_vm3, %v5066_v33, 0.0 }
 0x6cd   :  { %983 = vadd.xlane.f32.xlu1 %v982_v34 }
 0x71d   :  { %v1186_v35 = vpop.xlane.xlu0 %1185 }
 0x71e   :  { %4292 = vrcp.f32 %v1186_v35 }
 0x721   :  { %v1183_v36 = vpop.xlane.xlu0 %1182 }
 0x722   :  { %4294 = vrcp.f32 %v1183_v36 }
 0x725   :  { %v4036_v37 = vpop.permute.xlu0 %4035 }
 0x726   :  { %v4038_v40 = vunpack.i.h.bf16 %v4036_v37  ;;  %v4037_v41 = vunpack.i.l.bf16 %v4036_v37 }
 0x728   :  { %v3944_v42 = vpack.c.bf16 %v4038_v40, %v4037_v41  ;;  %v4293_v47 = vpop.eup %4292  ;;  %v4148_v40 = vld [vmem:[#allocation13 + $0x10] sm:$0xff]   ;;  %v4149_v41 = vld [vmem:[#allocation13 + $0x18] sm:$0xff]  }
 0x729   :  { %v1190_v51 = vmul.f32 %v4293_v47, %v4287_v17  ;;  %v4152_v47 = vld [vmem:[#allocation13 + $0x30] sm:$0xff]  }
 0x72a   :  { %3945 = vmatprep.subr.bf16.mxu0 %v3944_v42 }
 0x72b   :  { %3947 = vmatpush3.bf16.msra.mxu0 %v3944_v42  ;;  %v4150_v42 = vld [vmem:[#allocation13 + $0x20] sm:$0xff]  }
 0x72c   :  { %v4295_v48 = vpop.eup %4294  ;;  %3950 = vmatprep.subr.msk.bf16.mxu0 %vm4992_vm2, %v3948_v46 }
 0x72d   :  { %v1188_v50 = vmul.f32 %v4295_v48, %v4289_v1  ;;  %v4153_v48 = vld [vmem:[#allocation13 + $0x38] sm:$0xff]  }
 0x72f   :  { %3785 = vmatprep.mubr.msk.f32.mxu0 %vm772_vm3, %v1188_v50 }
 0x730   :  { %3786 = vmatmul.mubr.msk.f32.vlgmr.msra.gmra.mrb[12].mxu0 %vm772_vm3, %v1190_v51 }
 0x731   :  { %3792 = vmatprep.mubr.msk.f32.mxu0 %vm684_vm1, %v1279_v25 }
 0x734   :  { %3953 = vmatpush3.bf16.xpose.msk.msra.mxu0 %vm4992_vm2, %v3948_v46  ;;  %v4151_v46 = vld [vmem:[#allocation13 + $0x28] sm:$0xff]  }
 0x735   :  { %3822 = vmatprep.subr.bf16.mxu0 %v4675_v4 }
 0x73b   :  { %3793 = vmatmul.mubr.msk.f32.vlgmr.msra.gmra.mrb[14].mxu0 %vm684_vm1, %v1281_v26 }
 0x73c   :  { %3838 = vmatprep.mubr.msk.bf16.mxu0 %vm4677_vm0, %v4675_v4 }
 0x756   :  { %v969_v52 = vpop.xlane.xlu0 %968 }
 0x757   :  { %v973_v55 = vsub.f32 %v959_v31, %v969_v52 }
 0x759   :  { %v975_v57 = vmul.f32 1.442695, %v973_v55 }
 0x75a   :  { %v984_v23 = vpop.xlane.xlu1 %983 }
 0x75b   :  { %4296 = vpow2.f32 %v975_v57 }
 0x765   :  { %v4297_v5 = vpop.eup %4296 }
 0x766   :  { %v979_v6 = vsel %vm772_vm3, %v4297_v5, 0.0 }
 0x803   :  { %v5081_v53 = vpop.f32.mrb[12].mxu0 }
 0x804   :  { %v5083_v54 = vpop.f32.mrb[13].mxu0 }
 0x805   :  { %v4059_v56 = vpack.i.bf16 %v5081_v53, %v5083_v54 }
 0x80e   :  { %v3794_v58 = vpop.f32.mrb[14].mxu0 }
 0x80f   :  { %v1360_v60 = vpop.f32.mrb[15].mxu0  ;;  %v1366_v0 = vadd.f32 %v3794_v58, %v5008_v19 }
 0x810   :  { %v1361_v63 = vadd.f32 %v1360_v60, %v5010_v20 }
 0x811   :  { %v1372_v3 = vsel %vm772_vm3, %v1366_v0, -inf }
 0x812   :  { %v1369_v2 = vsel %vm772_vm3, %v1361_v63, -inf }
 0x813   :  { %1370 = vmax.xlane.f32.xlu0 %v1369_v2 }
 0x817   :  { %1373 = vmax.xlane.f32.xlu0 %v1372_v3 }
 0x81b   :  { %980 = vadd.xlane.f32.xlu0 %v979_v6 }
 0x8a0   :  { %v1371_v7 = vpop.xlane.xlu0 %1370 }
 0x8a1   :  { %v1375_v8 = vsub.f32 %v1361_v63, %v1371_v7 }
 0x8a3   :  { %v1377_v9 = vmul.f32 1.442695, %v1375_v8 }
 0x8a4   :  { %v1374_v10 = vpop.xlane.xlu0 %1373 }
 0x8a5   :  { %4298 = vpow2.f32 %v1377_v9  ;;  %v1376_v11 = vsub.f32 %v1366_v0, %v1374_v10 }
 0x8a7   :  { %v1379_v12 = vmul.f32 1.442695, %v1376_v11 }
 0x8a8   :  { %v981_v20 = vpop.xlane.xlu0 %980 }
 0x8a9   :  { %4300 = vpow2.f32 %v1379_v12 }
 0x8aa   :  { %4302 = vrcp.f32 %v981_v20 }
 0x8ab   :  { %4304 = vrcp.f32 %v984_v23  ;;  %v4351_v23 = vld [vmem:[#allocation2 + $0x8] sm:$0xff] }
 0x8af   :  { %v4299_v19 = vpop.eup %4298 }
 0x8b0   :  { %v1381_v14 = vsel %vm772_vm3, %v4299_v19, 0.0 }
 0x8b1   :  { %1382 = vadd.xlane.f32.xlu0 %v1381_v14 }
 0x8b3   :  { %v4301_v16 = vpop.eup %4300 }
 0x8b4   :  { %v4303_v21 = vpop.eup %4302  ;;  %v1384_v22 = vsel %vm772_vm3, %v4301_v16, 0.0 }
 0x8b5   :  { %1385 = vadd.xlane.f32.xlu1 %v1384_v22  ;;  %v986_v17 = vmul.f32 %v4303_v21, %v4297_v5  ;;  %v4305_v28 = vpop.eup %4304 }
 0x8b6   :  { %v988_v35 = vmul.f32 %v4305_v28, %v5066_v33  ;;  %v4147_v33 = vld [vmem:[#allocation13 + $0x8] sm:$0xff]  }
 0x8b7   :  { %3771 = vmatprep.mubr.msk.f32.mxu1 %vm772_vm3, %v986_v17  ;;  %v4162_v28 = vld [vmem:[#allocation16 + $0x24] ss:$8 sps:$4 sm:$0xff]  }
 0x8c6   :  { %4050 = vrot.lane.b32.xlu1 %v4996_v15, %s4679_s24 }
 0x8c7   :  { %4045 = vrot.lane.b32.xlu0 %v4996_v15, %s4678_s5 }
 0x93e   :  { %v1383_v1 = vpop.xlane.xlu0 %1382 }
 0x93f   :  { %4306 = vrcp.f32 %v1383_v1 }
 0x942   :  { %v1386_v18 = vpop.xlane.xlu1 %1385  ;;  %v4046_v24 = vpop.permute.xlu0 %4045 }
 0x943   :  { %4308 = vrcp.f32 %v1386_v18  ;;  %v4048_v25 = vunpack.i.h.bf16 %v4046_v24  ;;  %v4047_v26 = vunpack.i.l.bf16 %v4046_v24  ;;  %v4154_v18 = vld [vmem:[#allocation16] ss:$8 sps:$4 sm:$0xff]   ;;  %v4156_v24 = vld [vmem:[#allocation16 + $0x4] ss:$8 sps:$4 sm:$0xff]  }
 0x945   :  { %v3934_v27 = vpack.c.bf16 %v4048_v25, %v4047_v26  ;;  %v4159_v25 = vld [vmem:[#allocation16 + $0x14] ss:$8 sps:$4 sm:$0xff]   ;;  %v4163_v26 = vld [vmem:[#allocation14] sm:$0xff]  }
 0x946   :  { %v4051_v29 = vpop.permute.xlu1 %4050  ;;  %3823 = vmatpush3.bf16.msra.mxu0 %v4163_v26 }
 0x947   :  { %v4053_v31 = vunpack.i.h.bf16 %v4051_v29  ;;  %v4052_v32 = vunpack.i.l.bf16 %v4051_v29  ;;  %3935 = vmatprep.subr.bf16.mxu1 %v3934_v27  ;;  %3824 = vmatprep.subr.bf16.mxu0 %v4675_v4  ;;  %v4160_v29 = vld [vmem:[#allocation16 + $0x20] ss:$8 sps:$4 sm:$0xff]  }
 0x948   :  { %3937 = vmatpush3.bf16.msra.mxu1 %v3934_v27  ;;  %v4157_v27 = vld [vmem:[#allocation16 + $0x10] ss:$8 sps:$4 sm:$0xff]  }
 0x949   :  { %v4307_v34 = vpop.eup %4306  ;;  %v3954_v15 = vpack.c.bf16 %v4053_v31, %v4052_v32  ;;  %v4166_v31 = vld [vmem:[#allocation16 + $0x34] ss:$8 sps:$4 sm:$0xff]   ;;  %v4164_v32 = vld [vmem:[#allocation16 + $0x30] ss:$8 sps:$4 sm:$0xff]  }
 0x94a   :  { %v1388_v36 = vmul.f32 %v4307_v34, %v4299_v19 }
 0x94b   :  { %3772 = vmatmul.mubr.msk.f32.vlgmr.msra.gmra.mrb[4].mxu1 %vm772_vm3, %v988_v35  ;;  %3955 = vmatprep.subr.bf16.mxu1 %v3954_v15 }
 0x94c   :  { %3957 = vmatpush3.bf16.msra.mxu1 %v3954_v15  ;;  %3799 = vmatprep.mubr.msk.f32.mxu1 %vm772_vm3, %v1388_v36 }
 0x94d   :  { %v4309_v37 = vpop.eup %4308  ;;  %3802 = vmatprep.subr.bf16.mxu1 %v4675_v4 }
 0x94e   :  { %v1390_v38 = vmul.f32 %v4309_v37, %v4301_v16  ;;  %v4350_v16 = vld [vmem:[#allocation2] sm:$0xff] }
 0x950   :  { %3800 = vmatmul.mubr.msk.f32.vlgmr.msra.gmra.mrb[6].mxu1 %vm772_vm3, %v1390_v38 }
 0x951   :  { %3818 = vmatprep.mubr.msk.bf16.mxu1 %vm4677_vm0, %v4675_v4  ;;  %3803 = vmatpush3.bf16.msra.mxu1 %v4146_v39 }
 0x952   :  { %3804 = vmatprep.subr.bf16.mxu1 %v4675_v4 }
 0x955   :  { %3805 = vmatpush3.bf16.msra.mxu1 %v4147_v33 }
 0x956   :  { %3806 = vmatprep.subr.bf16.mxu1 %v4675_v4 }
 0x959   :  { %3807 = vmatpush3.bf16.msra.mxu1 %v4148_v40  ;;  %v4170_v40 = vld [vmem:[#allocation16 + $0x44] ss:$8 sps:$4 sm:$0xff]  }
 0x95a   :  { %3808 = vmatprep.subr.bf16.mxu1 %v4675_v4 }
 0x95d   :  { %3809 = vmatpush3.bf16.msra.mxu1 %v4149_v41  ;;  %v4168_v41 = vld [vmem:[#allocation16 + $0x40] ss:$8 sps:$4 sm:$0xff]  }
 0x95e   :  { %3810 = vmatprep.subr.bf16.mxu1 %v4675_v4 }
 0x961   :  { %3811 = vmatpush3.bf16.msra.mxu1 %v4150_v42  ;;  %v4167_v42 = vld [vmem:[#allocation14 + $0x8] sm:$0xff]  }
 0x962   :  { %3812 = vmatprep.subr.bf16.mxu1 %v4675_v4  ;;  %3825 = vmatpush3.bf16.msra.mxu0 %v4167_v42 }
 0x963   :  { %3826 = vmatprep.subr.bf16.mxu0 %v4675_v4 }
 0x965   :  { %3813 = vmatpush3.bf16.msra.mxu1 %v4151_v46  ;;  %v4174_v46 = vld [vmem:[#allocation16 + $0x54] ss:$8 sps:$4 sm:$0xff]  }
 0x966   :  { %3814 = vmatprep.subr.bf16.mxu1 %v4675_v4 }
 0x969   :  { %3815 = vmatpush3.bf16.msra.mxu1 %v4152_v47  ;;  %v4172_v47 = vld [vmem:[#allocation16 + $0x50] ss:$8 sps:$4 sm:$0xff]  }
 0x96a   :  { %3816 = vmatprep.subr.bf16.mxu1 %v4675_v4 }
 0x96d   :  { %3817 = vmatpush3.bf16.msra.mxu1 %v4153_v48  ;;  %v4171_v48 = vld [vmem:[#allocation14 + $0x10] sm:$0xff]  }
 0x96e   :  { %1826 = vmatprep.subr.bf16.mxu1 %v4156_v24  ;;  %3827 = vmatpush3.bf16.msra.mxu0 %v4171_v48 }
 0x96f   :  { %3828 = vmatprep.subr.bf16.mxu0 %v4675_v4 }
 0xa1e   :  { %v3773_v50 = vpop.f32.mrb[4].mxu1 }
 0xa1f   :  { %v1069_v51 = vpop.f32.mrb[5].mxu1 }
 0xa20   :  { %v4054_v52 = vpack.i.bf16 %v3773_v50, %v1069_v51  ;;  %v4178_v50 = vld [vmem:[#allocation16 + $0x64] ss:$8 sps:$4 sm:$0xff]   ;;  %v4176_v51 = vld [vmem:[#allocation16 + $0x60] ss:$8 sps:$4 sm:$0xff]  }
 0xa22   :  { %4055 = vrot.lane.b32.xlu1 %v4054_v52, %s4679_s24  ;;  %v4175_v52 = vld [vmem:[#allocation14 + $0x18] sm:$0xff]  }
 0xa23   :  { %v3801_v55 = vpop.f32.mrb[6].mxu1  ;;  %3829 = vmatpush3.bf16.msra.mxu0 %v4175_v52 }
 0xa24   :  { %v1469_v57 = vpop.f32.mrb[7].mxu1  ;;  %3830 = vmatprep.subr.bf16.mxu0 %v4675_v4 }
 0xa25   :  { %v4064_v58 = vpack.i.bf16 %v3801_v55, %v1469_v57  ;;  %v4182_v55 = vld [vmem:[#allocation16 + $0x74] ss:$8 sps:$4 sm:$0xff]   ;;  %v4180_v57 = vld [vmem:[#allocation16 + $0x70] ss:$8 sps:$4 sm:$0xff]  }
 0xa26   :  { %4060 = vrot.lane.b32.xlu1 %v4059_v56, %s4664_s17 }
 0xa27   :  { %4065 = vrot.lane.b32.xlu0 %v4064_v58, %s4678_s5  ;;  %v4179_v58 = vld [vmem:[#allocation14 + $0x20] sm:$0xff]  }
 0xa28   :  { %3831 = vmatpush3.bf16.msra.mxu0 %v4179_v58 }
 0xa29   :  { %3832 = vmatprep.subr.bf16.mxu0 %v4675_v4 }
 0xa94   :  { %v4056_v60 = vpop.permute.xlu1 %4055 }
 0xa95   :  { %v4058_v63 = vunpack.i.h.bf16 %v4056_v60  ;;  %v4057_v0 = vunpack.i.l.bf16 %v4056_v60  ;;  %v414_v60 = vld [vmem:[#allocation5] sm:$0xff] }
 0xa97   :  { %v1503_v7 = vsel %vm684_vm1, %v5044_v61, %v4058_v63  ;;  %v1502_v8 = vsel %vm684_vm1, %v5046_v62, %v4057_v0  ;;  %v1514_v61 = vrot.slane %v4966_v45, %v4981_v59  ;;  %v415_v63 = vld [vmem:[#allocation5 + $0x8] sm:$0xff] }
 0xa98   :  { %v4061_v2 = vpop.permute.xlu1 %4060  ;;  %v1734_v0 = vpack.c.bf16 %v415_v63, %v414_v60 }
 0xa99   :  { %v4063_v3 = vunpack.i.h.bf16 %v4061_v2  ;;  %v4062_v5 = vunpack.i.l.bf16 %v4061_v2  ;;  %v4066_v6 = vpop.permute.xlu0 %4065  ;;  %v4183_v2 = vld [vmem:[#allocation14 + $0x28] sm:$0xff]  }
 0xa9a   :  { %v4068_v9 = vunpack.i.h.bf16 %v4066_v6  ;;  %v4067_v53 = vunpack.i.l.bf16 %v4066_v6  ;;  %3833 = vmatpush3.bf16.msra.mxu0 %v4183_v2 }
 0xa9b   :  { %v1505_v54 = vsel %vm1504_vm4, %v1502_v8, %v4062_v5  ;;  %v1506_v56 = vsel %vm1504_vm4, %v1503_v7, %v4063_v3  ;;  %3834 = vmatprep.subr.bf16.mxu0 %v4675_v4  ;;  %v4184_v3 = vld [vmem:[#allocation14 + $0x30] sm:$0xff]   ;;  %v4185_v5 = vld [vmem:[#allocation14 + $0x38] sm:$0xff]  }
 0xa9c   :  { %v1509_v10 = vsel %vm1507_vm5, %v1506_v56, %v4068_v9  ;;  %v1508_v11 = vsel %vm1507_vm5, %v1505_v54, %v4067_v53  ;;  %v1630_v56 = vsub.s32 3, %v4961_v43 }
 0xa9d   :  { %v1510_v12 = vpack.c.bf16 %v1509_v10, %v1508_v11 }
 0xa9e   :  { %3835 = vmatpush3.bf16.msra.mxu0 %v4184_v3 }
 0xa9f   :  { %3819 = vmatmul.mubr.bf16.vlgmr.msra.gmra.mrb[8].mxu1 %v1510_v12  ;;  %3836 = vmatprep.subr.bf16.mxu0 %v4675_v4  ;;  %v1631_v12 = vrot.slane %v4966_v45, %v1630_v56 }
 0xaa0   :  { %1858 = vmatprep.mubr.bf16.mxu1 %v4676_v30  ;;  %1827 = vmatpush1.bf16.msra.mxu1 %v4154_v18  ;;  %v218_v18 = vld [vmem:[%s5342_s6] sm:$0x3] }
 0xaa1   :  { %1828 = vmatprep.subr.bf16.mxu1 %v4159_v25  ;;  %v1739_v24 = vrot.slane %v218_v18, %v4964_v44  ;;  %v1743_v25 = vrot.slane %v218_v18, %v4972_v49 }
 0xaa2   :  { %3837 = vmatpush3.bf16.msra.mxu0 %v4185_v5 }
 0xaa4   :  { %1829 = vmatpush1.bf16.msra.mxu1 %v4157_v27 }
 0xaa5   :  { %1830 = vmatprep.subr.bf16.mxu1 %v4162_v28 }
 0xaa8   :  { %1831 = vmatpush1.bf16.msra.mxu1 %v4160_v29 }
 0xaa9   :  { %1832 = vmatprep.subr.bf16.mxu1 %v4166_v31 }
 0xaac   :  { %1833 = vmatpush1.bf16.msra.mxu1 %v4164_v32 }
 0xaad   :  { %1834 = vmatprep.subr.bf16.mxu1 %v4170_v40 }
 0xab0   :  { %1835 = vmatpush1.bf16.msra.mxu1 %v4168_v41 }
 0xab1   :  { %1836 = vmatprep.subr.bf16.mxu1 %v4174_v46 }
 0xab4   :  { %1837 = vmatpush1.bf16.msra.mxu1 %v4172_v47 }
 0xab5   :  { %1838 = vmatprep.subr.bf16.mxu1 %v4178_v50  ;;  %v5174_v50 = vld [vmem:[#allocation8 + $0x8] sm:$0xff] }
 0xab8   :  { %1839 = vmatpush1.bf16.msra.mxu1 %v4176_v51  ;;  %v5176_v51 = vld [vmem:[#allocation8] sm:$0xff] }
 0xab9   :  { %1840 = vmatprep.subr.bf16.mxu1 %v4182_v55 }
 0xabc   :  { %1841 = vmatpush1.bf16.msra.mxu1 %v4180_v57 }
 0xabf   :  { %1859 = vmatmul.mubr.bf16.vlgmr.msra.gmra.mrb[12].mxu1 %v1734_v0 }
 0xb72   :  { %v1597_v20 = vpop.f32.mrb[8].mxu1 }
 0xb73   :  { %v1598_v19 = vadd.f32 %v1597_v20, %v1514_v61  ;;  %v3820_v62 = vpop.f32.mrb[9].mxu1 }
 0xb74   :  { %v1600_v14 = vpop.f32.mrb[10].mxu1 }
 0xb75   :  { %v5130_v21 = vadd.f32 %v4350_v16, %v1598_v19  ;;  %v1601_v22 = vadd.f32 %v1600_v14, %v1514_v61  ;;  %v3821_v17 = vpop.f32.mrb[11].mxu1  ;;  %v1636_v61 = vsub.s32 4, %v4961_v43 }
 0xb77   :  { %v5132_v1 = vadd.f32 %v4351_v23, %v1601_v22  ;;  %1606 = vadd.xlane.f32.xlu1 %v5130_v21  ;;  %v1637_v14 = vrot.slane %v4966_v45, %v1636_v61 }
 0xb79   :  { %1608 = vadd.xlane.f32.xlu0 %v5132_v1 }
 0xb92   :  { %v1860_v26 = vpop.f32.mrb[12].mxu1 }
 0xb93   :  { %v1861_v27 = vadd.f32 %v1860_v26, %v1739_v24  ;;  %v1862_v28 = vpop.f32.mrb[13].mxu1 }
 0xb94   :  { %v1863_v29 = vadd.f32 %v1862_v28, %v1743_v25  ;;  %v1864_v31 = vpop.f32.mrb[14].mxu1 }
 0xb95   :  { %v1865_v32 = vadd.f32 %v1864_v31, %v1739_v24 }
 0xc04   :  { %v1607_v34 = vpop.xlane.xlu1 %1606 }
 0xc05   :  { %v1610_v35 = vmul.f32 0.0078125, %v1607_v34  ;;  %v1866_v34 = vpop.f32.mrb[15].mxu1 }
 0xc06   :  { %v1609_v15 = vpop.xlane.xlu0 %1608 }
 0xc07   :  { %v1612_v36 = vsub.f32 %v5130_v21, %v1610_v35  ;;  %v1611_v37 = vmul.f32 0.0078125, %v1609_v15  ;;  %v1867_v35 = vadd.f32 %v1866_v34, %v1743_v25  ;;  %v3958_v15 = vpack.c.bf16 %v1865_v32, %v1861_v27 }
 0xc09   :  { %v1613_v38 = vsub.f32 %v5132_v1, %v1611_v37  ;;  %v1614_v39 = vmul.f32 %v1612_v36, %v1612_v36  ;;  %3960 = vmatprep.subr.msk.bf16.mxu0 %vm4992_vm2, %v3958_v15  ;;  %v5158_v37 = vpack.i.bf16 %v1865_v32, %v1861_v27 }
 0xc0b   :  { %1616 = vadd.xlane.f32.xlu0 %v1614_v39  ;;  %v1615_v33 = vmul.f32 %v1613_v38, %v1613_v38  ;;  %v1643_v39 = vsub.s32 5, %v4961_v43 }
 0xc0f   :  { %1618 = vadd.xlane.f32.xlu0 %v1615_v33  ;;  %v1644_v33 = vrot.slane %v4966_v45, %v1643_v39 }
 0xc98   :  { %v1617_v6 = vpop.xlane.xlu0 %1616 }
 0xc99   :  { %v1620_v7 = vmul.f32 0.0078125, %v1617_v6 }
 0xc9b   :  { %v1622_v8 = vadd.f32 1e-06, %v1620_v7 }
 0xc9c   :  { %v1619_v9 = vpop.xlane.xlu0 %1618 }
 0xc9d   :  { %4310 = vrsqrt.f32 %v1622_v8  ;;  %v1621_v53 = vmul.f32 0.0078125, %v1619_v9 }
 0xc9f   :  { %v1623_v54 = vadd.f32 1e-06, %v1621_v53 }
 0xca1   :  { %4312 = vrsqrt.f32 %v1623_v54 }
 0xca7   :  { %v4311_v10 = vpop.eup %4310 }
 0xca8   :  { %v1626_v11 = vmul.f32 %v4311_v10, %v1612_v36  ;;  %v3964_v36 = vpack.c.bf16 %v1867_v35, %v1863_v29 }
 0xcaa   :  { %v1632_v62 = vmul.f32 %v1631_v12, %v1626_v11 }
 0xcab   :  { %v4313_v20 = vpop.eup %4312 }
 0xcac   :  { %v1627_v19 = vmul.f32 %v4313_v20, %v1613_v38  ;;  %v1638_v22 = vadd.f32 %v1637_v14, %v1632_v62  ;;  %v5160_v38 = vpack.i.bf16 %v1867_v35, %v1863_v29 }
 0xcae   :  { %v1633_v16 = vmul.f32 %v1631_v12, %v1627_v19 }
 0xcb0   :  { %v1639_v17 = vadd.f32 %v1637_v14, %v1633_v16 }
 0xcb2   :  { %v1640_v23 = vpack.c.bf16 %v1639_v17, %v1638_v22 }
 0xcb4   :  { %3839 = vmatmul.mubr.bf16.vlgmr.msra.gmra.mrb[16].mxu0 %v1640_v23 }
 0xcb5   :  { %3963 = vmatpush3.bf16.xpose.msk.msra.mxu0 %vm4992_vm2, %v3958_v15 }
 0xcb6   :  { %3965 = vmatprep.subr.bf16.mxu0 %v3964_v36 }
 0xd87   :  { %v1727_v40 = vpop.f32.mrb[16].mxu0 }
 0xd88   :  { %v5166_v41 = vadd.f32 %v1727_v40, %v1644_v33  ;;  %v3840_v42 = vpop.f32.mrb[17].mxu0 }
 0xd89   :  { %v1730_v46 = vpop.f32.mrb[18].mxu0 }
 0xd8a   :  { %v5168_v47 = vadd.f32 %v1730_v46, %v1644_v33  ;;  %v3841_v48 = vpop.f32.mrb[19].mxu0  ;;  %3846 = vmatprep.mubr.msk.f32.mxu0 %vm684_vm1, %v5166_v41 }
 0xd8c   :  { %3847 = vmatmul.mubr.msk.f32.vlgmr.msra.gmra.mrb[20].mxu0 %vm684_vm1, %v5168_v47 }
 0xd8d   :  { %3967 = vmatpush3.bf16.msra.mxu0 %v3964_v36 }
 0xe5f   :  { %v3848_v45 = vpop.f32.mrb[20].mxu0 }
 0xe60   :  { %v1953_v52 = vadd.f32 %v3848_v45, %v5174_v50  ;;  %v1947_v55 = vpop.f32.mrb[21].mxu0 }
 0xe61   :  { %v1948_v57 = vadd.f32 %v1947_v55, %v5176_v51 }
 0xe62   :  { %v1959_v58 = vsel %vm772_vm3, %v1953_v52, -inf }
 0xe63   :  { %1960 = vmax.xlane.f32.xlu0 %v1959_v58  ;;  %v1956_v60 = vsel %vm772_vm3, %v1948_v57, -inf }
 0xe64   :  { %1957 = vmax.xlane.f32.xlu1 %v1956_v60 }
 0xe75   :  { %4070 = vrot.lane.b32.xlu1 %v5158_v37, %s4678_s5 }
 0xef0   :  { %v1961_v63 = vpop.xlane.xlu0 %1960 }
 0xef1   :  { %v1963_v0 = vsub.f32 %v1953_v52, %v1961_v63  ;;  %v1958_v2 = vpop.xlane.xlu1 %1957 }
 0xef2   :  { %v1962_v3 = vsub.f32 %v1948_v57, %v1958_v2 }
 0xef3   :  { %v1966_v5 = vmul.f32 1.442695, %v1963_v0 }
 0xef4   :  { %v1964_v6 = vmul.f32 1.442695, %v1962_v3 }
 0xef5   :  { %4314 = vpow2.f32 %v1966_v5  ;;  %v4071_v7 = vpop.permute.xlu1 %4070 }
 0xef6   :  { %4316 = vpow2.f32 %v1964_v6  ;;  %v4073_v8 = vunpack.i.h.bf16 %v4071_v7  ;;  %v4072_v9 = vunpack.i.l.bf16 %v4071_v7 }
 0xef8   :  { %v3968_v53 = vpack.c.bf16 %v4073_v8, %v4072_v9 }
 0xefa   :  { %3970 = vmatprep.subr.msk.bf16.mxu0 %vm4992_vm2, %v3968_v53 }
 0xeff   :  { %v4315_v54 = vpop.eup %4314 }
 0xf00   :  { %v4317_v10 = vpop.eup %4316  ;;  %v1971_v11 = vsel %vm772_vm3, %v4315_v54, 0.0 }
 0xf01   :  { %1972 = vadd.xlane.f32.xlu0 %v1971_v11  ;;  %v1968_v12 = vsel %vm772_vm3, %v4317_v10, 0.0 }
 0xf02   :  { %1969 = vadd.xlane.f32.xlu1 %v1968_v12 }
 0xf13   :  { %2061 = vrot.lane.b32.xlu1 %v5168_v47, %s4678_s5 }
 0xf17   :  { %2059 = vrot.lane.b32.xlu0 %v5166_v41, %s4678_s5 }
 0xf8e   :  { %v1973_v61 = vpop.xlane.xlu0 %1972 }
 0xf8f   :  { %4318 = vrcp.f32 %v1973_v61  ;;  %v1970_v20 = vpop.xlane.xlu1 %1969 }
 0xf90   :  { %4320 = vrcp.f32 %v1970_v20 }
 0xf92   :  { %v2060_v22 = vpop.permute.xlu0 %2059 }
 0xf93   :  { %v2062_v17 = vpop.permute.xlu1 %2061 }
 0xf99   :  { %v4319_v19 = vpop.eup %4318 }
 0xf9a   :  { %v4321_v62 = vpop.eup %4320  ;;  %v1977_v16 = vmul.f32 %v4319_v19, %v4315_v54 }
 0xf9b   :  { %v1975_v14 = vmul.f32 %v4321_v62, %v4317_v10 }
 0xf9d   :  { %3853 = vmatprep.mubr.msk.f32.mxu0 %vm772_vm3, %v1975_v14 }
 0xf9e   :  { %3854 = vmatmul.mubr.msk.f32.vlgmr.msra.gmra.mrb[22].mxu0 %vm772_vm3, %v1977_v16 }
 0xf9f   :  { %3973 = vmatpush3.bf16.xpose.msk.msra.mxu0 %vm4992_vm2, %v3968_v53  ;;  %3860 = vmatprep.mubr.msk.f32.mxu0 %vm684_vm1, %v2060_v22 }
 0xfa6   :  { %3861 = vmatmul.mubr.msk.f32.vlgmr.msra.gmra.mrb[24].mxu0 %vm684_vm1, %v2062_v17 }
0x1071   :  { %v5198_v23 = vpop.f32.mrb[22].mxu0 }
0x1072   :  { %v5200_v18 = vpop.f32.mrb[23].mxu0 }
0x1079   :  { %v3862_v24 = vpop.f32.mrb[24].mxu0 }
0x107a   :  { %v2147_v25 = vadd.f32 %v3862_v24, %v5174_v50  ;;  %v2141_v26 = vpop.f32.mrb[25].mxu0 }
0x107b   :  { %v2142_v27 = vadd.f32 %v2141_v26, %v5176_v51 }
0x107c   :  { %v2153_v28 = vsel %vm772_vm3, %v2147_v25, -inf }
0x107d   :  { %2154 = vmax.xlane.f32.xlu0 %v2153_v28  ;;  %v2150_v29 = vsel %vm772_vm3, %v2142_v27, -inf }
0x107e   :  { %2151 = vmax.xlane.f32.xlu1 %v2150_v29 }
0x110a   :  { %v2155_v31 = vpop.xlane.xlu0 %2154 }
0x110b   :  { %v2157_v32 = vsub.f32 %v2147_v25, %v2155_v31  ;;  %v2152_v34 = vpop.xlane.xlu1 %2151 }
0x110c   :  { %v2156_v35 = vsub.f32 %v2142_v27, %v2152_v34 }
0x110d   :  { %v2160_v15 = vmul.f32 1.442695, %v2157_v32 }
0x110e   :  { %v2158_v36 = vmul.f32 1.442695, %v2156_v35 }
0x110f   :  { %4322 = vpow2.f32 %v2160_v15 }
0x1110   :  { %4324 = vpow2.f32 %v2158_v36 }
0x1119   :  { %v4323_v39 = vpop.eup %4322 }
0x111a   :  { %v4325_v33 = vpop.eup %4324  ;;  %v2165_v40 = vsel %vm772_vm3, %v4323_v39, 0.0 }
0x111b   :  { %2166 = vadd.xlane.f32.xlu1 %v2165_v40  ;;  %v2162_v42 = vsel %vm772_vm3, %v4325_v33, 0.0 }
0x111c   :  { %2163 = vadd.xlane.f32.xlu0 %v2162_v42 }
0x112c   :  { %4080 = vrot.lane.b32.xlu1 %v5158_v37, %s4664_s17 }
0x1130   :  { %4085 = vrot.lane.b32.xlu1 %v5158_v37, %s4679_s24 }
0x1132   :  { %4075 = vrot.lane.b32.xlu0 %v5160_v38, %s4678_s5 }
0x1134   :  { %2261 = vrot.lane.b32.xlu1 %v5166_v41, %s4664_s17 }
0x1136   :  { %2263 = vrot.lane.b32.xlu0 %v5168_v47, %s4664_s17 }
0x1138   :  { %2461 = vrot.lane.b32.xlu1 %v5166_v41, %s4679_s24 }
0x113a   :  { %2463 = vrot.lane.b32.xlu0 %v5168_v47, %s4679_s24 }
0x11a8   :  { %v2167_v46 = vpop.xlane.xlu1 %2166 }
0x11a9   :  { %4326 = vrcp.f32 %v2167_v46  ;;  %v2164_v48 = vpop.xlane.xlu0 %2163 }
0x11aa   :  { %4328 = vrcp.f32 %v2164_v48 }
0x11ac   :  { %v4081_v37 = vpop.permute.xlu1 %4080 }
0x11ad   :  { %v4076_v45 = vpop.permute.xlu0 %4075  ;;  %v4083_v52 = vunpack.i.h.bf16 %v4081_v37  ;;  %v4082_v55 = vunpack.i.l.bf16 %v4081_v37 }
0x11ae   :  { %v4078_v57 = vunpack.i.h.bf16 %v4076_v45  ;;  %v4077_v58 = vunpack.i.l.bf16 %v4076_v45 }
0x11af   :  { %v3978_v3 = vpack.c.bf16 %v4083_v52, %v4082_v55 }
0x11b0   :  { %v3974_v60 = vpack.c.bf16 %v4078_v57, %v4077_v58  ;;  %v4086_v63 = vpop.permute.xlu1 %4085 }
0x11b1   :  { %v4088_v0 = vunpack.i.h.bf16 %v4086_v63  ;;  %v4087_v2 = vunpack.i.l.bf16 %v4086_v63  ;;  %v2264_v9 = vpop.permute.xlu0 %2263 }
0x11b2   :  { %3975 = vmatprep.subr.bf16.mxu0 %v3974_v60 }
0x11b3   :  { %v4327_v41 = vpop.eup %4326  ;;  %v3988_v5 = vpack.c.bf16 %v4088_v0, %v4087_v2  ;;  %3977 = vmatpush3.bf16.msra.mxu0 %v3974_v60 }
0x11b4   :  { %v4329_v47 = vpop.eup %4328  ;;  %v2262_v6 = vpop.permute.xlu1 %2261  ;;  %3980 = vmatprep.subr.msk.bf16.mxu0 %vm4992_vm2, %v3978_v3  ;;  %v2171_v8 = vmul.f32 %v4327_v41, %v4323_v39 }
0x11b5   :  { %3990 = vmatprep.subr.msk.bf16.mxu1 %vm4992_vm2, %v3988_v5  ;;  %v2169_v7 = vmul.f32 %v4329_v47, %v4325_v33  ;;  %v2464_v54 = vpop.permute.xlu0 %2463 }
0x11b6   :  { %3993 = vmatpush3.bf16.xpose.msk.msra.mxu1 %vm4992_vm2, %v3988_v5 }
0x11b7   :  { %3867 = vmatprep.mubr.msk.f32.mxu0 %vm772_vm3, %v2169_v7  ;;  %3898 = vmatprep.subr.bf16.mxu1 %v4675_v4 }
0x11b8   :  { %3868 = vmatmul.mubr.msk.f32.vlgmr.msra.gmra.mrb[26].mxu0 %vm772_vm3, %v2171_v8  ;;  %v2462_v53 = vpop.permute.xlu1 %2461 }
0x11b9   :  { %3874 = vmatprep.mubr.msk.f32.mxu0 %vm684_vm1, %v2262_v6  ;;  %3888 = vmatprep.mubr.msk.f32.mxu1 %vm684_vm1, %v2462_v53 }
0x11bc   :  { %3983 = vmatpush3.bf16.xpose.msk.msra.mxu0 %vm4992_vm2, %v3978_v3 }
0x11bd   :  { %3889 = vmatmul.mubr.msk.f32.vlgmr.msra.gmra.mrb[16].mxu1 %vm684_vm1, %v2464_v54 }
0x11be   :  { %3914 = vmatprep.mubr.msk.bf16.mxu1 %vm4677_vm0, %v4675_v4 }
0x11c3   :  { %3875 = vmatmul.mubr.msk.f32.vlgmr.msra.gmra.mrb[28].mxu0 %vm684_vm1, %v2264_v9 }
0x128b   :  { %v3869_v10 = vpop.f32.mrb[26].mxu0 }
0x128c   :  { %v2252_v11 = vpop.f32.mrb[27].mxu0 }
0x128d   :  { %v4099_v12 = vpack.i.bf16 %v3869_v10, %v2252_v11 }
0x1290   :  { %v3890_v61 = vpop.f32.mrb[16].mxu1 }
0x1291   :  { %v2543_v20 = vpop.f32.mrb[17].mxu1  ;;  %v2549_v24 = vadd.f32 %v3890_v61, %v5174_v50  ;;  %v4187_v61 = vld [vmem:[#allocation17 + $0x8] sm:$0xff]  }
0x1292   :  { %v2544_v13 = vadd.f32 %v2543_v20, %v5176_v51  ;;  %v4188_v20 = vld [vmem:[#allocation17 + $0x10] sm:$0xff]  }
0x1293   :  { %v2555_v26 = vsel %vm772_vm3, %v2549_v24, -inf }
0x1294   :  { %v2552_v25 = vsel %vm772_vm3, %v2544_v13, -inf }
0x1296   :  { %v3876_v19 = vpop.f32.mrb[28].mxu0 }
0x1297   :  { %v2349_v62 = vadd.f32 %v3876_v19, %v5174_v50  ;;  %v2343_v14 = vpop.f32.mrb[29].mxu0  ;;  %v4189_v19 = vld [vmem:[#allocation17 + $0x18] sm:$0xff]  }
0x1298   :  { %v2344_v16 = vadd.f32 %v2343_v14, %v5176_v51  ;;  %v4191_v14 = vld [vmem:[#allocation17 + $0x28] sm:$0xff]  }
0x1299   :  { %v2355_v22 = vsel %vm772_vm3, %v2349_v62, -inf }
0x129a   :  { %2356 = vmax.xlane.f32.xlu0 %v2355_v22  ;;  %v2352_v17 = vsel %vm772_vm3, %v2344_v16, -inf }
0x129b   :  { %2353 = vmax.xlane.f32.xlu1 %v2352_v17 }
0x129e   :  { %2553 = vmax.xlane.f32.xlu0 %v2552_v25 }
0x12a2   :  { %2556 = vmax.xlane.f32.xlu0 %v2555_v26 }
0x1327   :  { %v2357_v27 = vpop.xlane.xlu0 %2356 }
0x1328   :  { %v2354_v28 = vpop.xlane.xlu1 %2353  ;;  %v2359_v51 = vsub.f32 %v2349_v62, %v2357_v27  ;;  %v4190_v62 = vld [vmem:[#allocation17 + $0x20] sm:$0xff]  }
0x1329   :  { %v2358_v29 = vsub.f32 %v2344_v16, %v2354_v28  ;;  %v4192_v16 = vld [vmem:[#allocation17 + $0x30] sm:$0xff]  }
0x132a   :  { %v2362_v39 = vmul.f32 1.442695, %v2359_v51 }
0x132b   :  { %v2554_v31 = vpop.xlane.xlu0 %2553  ;;  %v2360_v34 = vmul.f32 1.442695, %v2358_v29 }
0x132c   :  { %v2558_v32 = vsub.f32 %v2544_v13, %v2554_v31  ;;  %v4193_v13 = vld [vmem:[#allocation17 + $0x38] sm:$0xff]  }
0x132e   :  { %v2560_v35 = vmul.f32 1.442695, %v2558_v32 }
0x132f   :  { %v2557_v15 = vpop.xlane.xlu0 %2556 }
0x1330   :  { %4330 = vpow2.f32 %v2560_v35  ;;  %v2559_v36 = vsub.f32 %v2549_v24, %v2557_v15 }
0x1331   :  { %4332 = vpow2.f32 %v2360_v34 }
0x1332   :  { %v2562_v50 = vmul.f32 1.442695, %v2559_v36 }
0x1334   :  { %4334 = vpow2.f32 %v2562_v50 }
0x1335   :  { %4336 = vpow2.f32 %v2362_v39 }
0x133a   :  { %v4331_v33 = vpop.eup %4330 }
0x133b   :  { %v2564_v40 = vsel %vm772_vm3, %v4331_v33, 0.0  ;;  %v4333_v42 = vpop.eup %4332 }
0x133c   :  { %2565 = vadd.xlane.f32.xlu1 %v2564_v40  ;;  %v2364_v37 = vsel %vm772_vm3, %v4333_v42, 0.0 }
0x133e   :  { %v4335_v46 = vpop.eup %4334 }
0x133f   :  { %v2567_v48 = vsel %vm772_vm3, %v4335_v46, 0.0  ;;  %v4337_v45 = vpop.eup %4336 }
0x1340   :  { %2568 = vadd.xlane.f32.xlu0 %v2567_v48  ;;  %2365 = vadd.xlane.f32.xlu1 %v2364_v37  ;;  %v2367_v52 = vsel %vm772_vm3, %v4337_v45, 0.0  ;;  %v2694_v48 = vsub.s32 6, %v4961_v43 }
0x1344   :  { %2368 = vadd.xlane.f32.xlu0 %v2367_v52 }
0x1351   :  { %4090 = vrot.lane.b32.xlu1 %v5160_v38, %s4664_s17 }
0x1355   :  { %4100 = vrot.lane.b32.xlu1 %v4099_v12, %s4679_s24  ;;  %v4186_v12 = vld [vmem:[#allocation17] sm:$0xff]  }
0x1356   :  { %3899 = vmatpush3.bf16.msra.mxu1 %v4186_v12  ;;  %v4206_v12 = vld [vmem:[#allocation19 + $0x40] ss:$16 sps:$4 sm:$0xff]  }
0x1357   :  { %3900 = vmatprep.subr.bf16.mxu1 %v4675_v4 }
0x135a   :  { %4095 = vrot.lane.b32.xlu0 %v5160_v38, %s4679_s24  ;;  %3901 = vmatpush3.bf16.msra.mxu1 %v4187_v61  ;;  %v4209_v61 = vld [vmem:[#allocation19 + $0x48] ss:$16 sps:$4 sm:$0xff]  }
0x135b   :  { %3902 = vmatprep.subr.bf16.mxu1 %v4675_v4 }
0x135e   :  { %3903 = vmatpush3.bf16.msra.mxu1 %v4188_v20  ;;  %v4214_v20 = vld [vmem:[#allocation19 + $0x64] ss:$16 sps:$4 sm:$0xff]  }
0x135f   :  { %3904 = vmatprep.subr.bf16.mxu1 %v4675_v4 }
0x1362   :  { %3905 = vmatpush3.bf16.msra.mxu1 %v4189_v19  ;;  %v4217_v19 = vld [vmem:[#allocation19 + $0x6c] ss:$16 sps:$4 sm:$0xff]  }
0x1363   :  { %3906 = vmatprep.subr.bf16.mxu1 %v4675_v4 }
0x1366   :  { %3907 = vmatpush3.bf16.msra.mxu1 %v4190_v62  ;;  %v4212_v62 = vld [vmem:[#allocation19 + $0x60] ss:$16 sps:$4 sm:$0xff]  }
0x1367   :  { %3908 = vmatprep.subr.bf16.mxu1 %v4675_v4 }
0x136a   :  { %3909 = vmatpush3.bf16.msra.mxu1 %v4191_v14  ;;  %v4215_v14 = vld [vmem:[#allocation19 + $0x68] ss:$16 sps:$4 sm:$0xff]  }
0x136b   :  { %3910 = vmatprep.subr.bf16.mxu1 %v4675_v4 }
0x136e   :  { %3911 = vmatpush3.bf16.msra.mxu1 %v4192_v16  ;;  %v4220_v16 = vld [vmem:[#allocation19 + $0x84] ss:$16 sps:$4 sm:$0xff]  }
0x136f   :  { %3912 = vmatprep.subr.bf16.mxu1 %v4675_v4 }
0x1372   :  { %3913 = vmatpush3.bf16.msra.mxu1 %v4193_v13  ;;  %v4223_v13 = vld [vmem:[#allocation19 + $0x8c] ss:$16 sps:$4 sm:$0xff]  }
0x13c9   :  { %v2566_v55 = vpop.xlane.xlu1 %2565 }
0x13cd   :  { %v2569_v57 = vpop.xlane.xlu0 %2568  ;;  %v2366_v58 = vpop.xlane.xlu1 %2365 }
0x13ce   :  { %4338 = vrcp.f32 %v2366_v58 }
0x13cf   :  { %4340 = vrcp.f32 %v2566_v55 }
0x13d1   :  { %v2369_v60 = vpop.xlane.xlu0 %2368  ;;  %v4091_v63 = vpop.permute.xlu1 %4090 }
0x13d2   :  { %4342 = vrcp.f32 %v2369_v60  ;;  %v4093_v0 = vunpack.i.h.bf16 %v4091_v63  ;;  %v4092_v2 = vunpack.i.l.bf16 %v4091_v63 }
0x13d3   :  { %4344 = vrcp.f32 %v2569_v57 }
0x13d4   :  { %v3984_v3 = vpack.c.bf16 %v4093_v0, %v4092_v2  ;;  %v4196_v0 = vld [vmem:[#allocation19 + $0x4] ss:$16 sps:$4 sm:$0xff]   ;;  %v4197_v2 = vld [vmem:[#allocation19 + $0x8] ss:$16 sps:$4 sm:$0xff]  }
0x13d5   :  { %v4096_v41 = vpop.permute.xlu0 %4095  ;;  %v4101_v28 = vpop.permute.xlu1 %4100 }
0x13d6   :  { %v4098_v5 = vunpack.i.h.bf16 %v4096_v41  ;;  %v4097_v47 = vunpack.i.l.bf16 %v4096_v41  ;;  %3985 = vmatprep.subr.bf16.mxu0 %v3984_v3  ;;  %v4103_v31 = vunpack.i.h.bf16 %v4101_v28  ;;  %v4102_v32 = vunpack.i.l.bf16 %v4101_v28  ;;  %v4202_v41 = vld [vmem:[#allocation19 + $0x24] ss:$16 sps:$4 sm:$0xff]  }
0x13d7   :  { %3987 = vmatpush3.bf16.msra.mxu0 %v3984_v3  ;;  %v4199_v3 = vld [vmem:[#allocation19 + $0xc] ss:$16 sps:$4 sm:$0xff]   ;;  %v4232_v28 = vld [vmem:[#allocation19 + $0xc4] ss:$16 sps:$4 sm:$0xff]  }
0x13d8   :  { %v3994_v6 = vpack.c.bf16 %v4098_v5, %v4097_v47  ;;  %v4339_v7 = vpop.eup %4338  ;;  %v2686_v4 = vsel %vm684_vm1, %v5198_v23, %v4103_v31  ;;  %v2685_v15 = vsel %vm684_vm1, %v5200_v18, %v4102_v32  ;;  %v5280_v23 = vld [vmem:[#allocation10] sm:$0xff]  ;;  %v4205_v5 = vld [vmem:[#allocation19 + $0x2c] ss:$16 sps:$4 sm:$0xff]   ;;  %3046 = vmatprep.subr.bf16.mxu1 %v4199_v3  ;;  %v4203_v47 = vld [vmem:[#allocation19 + $0x28] ss:$16 sps:$4 sm:$0xff]  }
0x13d9   :  { %v2371_v38 = vmul.f32 %v4339_v7, %v4333_v42  ;;  %v4341_v8 = vpop.eup %4340  ;;  %v2695_v18 = vrot.slane %v5280_v23, %v2694_v48  ;;  %v4230_v31 = vld [vmem:[#allocation19 + $0xc0] ss:$16 sps:$4 sm:$0xff]   ;;  %v4233_v32 = vld [vmem:[#allocation19 + $0xc8] ss:$16 sps:$4 sm:$0xff]   ;;  %v2811_v48 = vsub.s32 7, %v4961_v43 }
0x13da   :  { %3995 = vmatprep.subr.bf16.mxu0 %v3994_v6  ;;  %v2571_v10 = vmul.f32 %v4341_v8, %v4331_v33 }
0x13db   :  { %3881 = vmatprep.mubr.msk.f32.mxu0 %vm772_vm3, %v2371_v38 }
0x13dc   :  { %v4343_v9 = vpop.eup %4342 }
0x13dd   :  { %v2373_v53 = vmul.f32 %v4343_v9, %v4337_v45  ;;  %v4345_v54 = vpop.eup %4344 }
0x13de   :  { %v2573_v11 = vmul.f32 %v4345_v54, %v4335_v46 }
0x13df   :  { %3882 = vmatmul.mubr.msk.f32.vlgmr.msra.gmra.mrb[30].mxu0 %vm772_vm3, %v2373_v53 }
0x13e0   :  { %3997 = vmatpush3.bf16.msra.mxu0 %v3994_v6  ;;  %3895 = vmatprep.mubr.msk.f32.mxu0 %vm772_vm3, %v2571_v10  ;;  %v4208_v10 = vld [vmem:[#allocation19 + $0x44] ss:$16 sps:$4 sm:$0xff]  }
0x13e1   :  { %3003 = vmatprep.subr.bf16.mxu0 %v4196_v0 }
0x13e3   :  { %3896 = vmatmul.mubr.msk.f32.vlgmr.msra.gmra.mrb[32].mxu0 %vm772_vm3, %v2573_v11  ;;  %v4211_v11 = vld [vmem:[#allocation19 + $0x4c] ss:$16 sps:$4 sm:$0xff]  }
0x13e4   :  { %3035 = vmatprep.mubr.bf16.mxu0 %v4676_v30 }
0x14b2   :  { %v3883_v22 = vpop.f32.mrb[30].mxu0 }
0x14b3   :  { %v2452_v17 = vpop.f32.mrb[31].mxu0 }
0x14b4   :  { %v4104_v24 = vpack.i.bf16 %v3883_v22, %v2452_v17  ;;  %v4218_v22 = vld [vmem:[#allocation19 + $0x80] ss:$16 sps:$4 sm:$0xff]   ;;  %v4221_v17 = vld [vmem:[#allocation19 + $0x88] ss:$16 sps:$4 sm:$0xff]  }
0x14b6   :  { %4105 = vrot.lane.b32.xlu1 %v4104_v24, %s4664_s17  ;;  %v3897_v25 = vpop.f32.mrb[32].mxu0  ;;  %v4226_v24 = vld [vmem:[#allocation19 + $0xa4] ss:$16 sps:$4 sm:$0xff]  }
0x14b7   :  { %v2652_v26 = vpop.f32.mrb[33].mxu0 }
0x14b8   :  { %v4109_v27 = vpack.i.bf16 %v3897_v25, %v2652_v26  ;;  %v4229_v25 = vld [vmem:[#allocation19 + $0xac] ss:$16 sps:$4 sm:$0xff]   ;;  %v4224_v26 = vld [vmem:[#allocation19 + $0xa0] ss:$16 sps:$4 sm:$0xff]  }
0x14ba   :  { %4110 = vrot.lane.b32.xlu1 %v4109_v27, %s4678_s5  ;;  %v4227_v27 = vld [vmem:[#allocation19 + $0xa8] ss:$16 sps:$4 sm:$0xff]  }
0x1528   :  { %v4106_v29 = vpop.permute.xlu1 %4105 }
0x1529   :  { %v4108_v51 = vunpack.i.h.bf16 %v4106_v29  ;;  %v4107_v34 = vunpack.i.l.bf16 %v4106_v29  ;;  %v4235_v29 = vld [vmem:[#allocation19 + $0xcc] ss:$16 sps:$4 sm:$0xff]  }
0x152b   :  { %v2688_v50 = vsel %vm1504_vm4, %v2686_v4, %v4108_v51  ;;  %v2687_v33 = vsel %vm1504_vm4, %v2685_v15, %v4107_v34  ;;  %v4238_v51 = vld [vmem:[#allocation19 + $0xe4] ss:$16 sps:$4 sm:$0xff]   ;;  %v4241_v34 = vld [vmem:[#allocation19 + $0xec] ss:$16 sps:$4 sm:$0xff]   ;;  %v4239_v4 = vld [vmem:[#allocation19 + $0xe8] ss:$16 sps:$4 sm:$0xff]  }
0x152c   :  { %v4111_v35 = vpop.permute.xlu1 %4110  ;;  %v4242_v15 = vld [vmem:[#allocation20 + $0x40] sm:$0xff]  }
0x152d   :  { %v4113_v36 = vunpack.i.h.bf16 %v4111_v35  ;;  %v4112_v39 = vunpack.i.l.bf16 %v4111_v35  ;;  %v4236_v35 = vld [vmem:[#allocation19 + $0xe0] ss:$16 sps:$4 sm:$0xff]  }
0x152f   :  { %v2690_v40 = vsel %vm1507_vm5, %v2688_v50, %v4113_v36  ;;  %v2689_v42 = vsel %vm1507_vm5, %v2687_v33, %v4112_v39  ;;  %v4243_v36 = vld [vmem:[#allocation20 + $0xc0] sm:$0xff]  }
0x1530   :  { %v2691_v46 = vpack.c.bf16 %v2690_v40, %v2689_v42 }
0x1532   :  { %3915 = vmatmul.mubr.bf16.vlgmr.msra.gmra.mrb[20].mxu1 %v2691_v46 }
0x1533   :  { %3078 = vmatprep.mubr.bf16.mxu1 %v4676_v30  ;;  %v4194_v30 = vld [vmem:[#allocation19] ss:$16 sps:$4 sm:$0xff]   ;;  %3047 = vmatpush1.bf16.msra.mxu1 %v4197_v2 }
0x1534   :  { %3004 = vmatpush1.bf16.msra.mxu0 %v4194_v30  ;;  %3048 = vmatprep.subr.bf16.mxu1 %v4205_v5  ;;  %v4245_v5 = vld [vmem:[#allocation20 + $0x80] sm:$0xff]  }
0x1535   :  { %3005 = vmatprep.subr.bf16.mxu0 %v4202_v41  ;;  %v4244_v41 = vld [vmem:[#allocation20] sm:$0xff]  }
0x1537   :  { %3049 = vmatpush1.bf16.msra.mxu1 %v4203_v47  ;;  %v4246_v47 = vld [vmem:[#allocation20 + $0x48] sm:$0xff]  }
0x1538   :  { %3050 = vmatprep.subr.bf16.mxu1 %v4211_v11  ;;  %v4257_v11 = vld [vmem:[#allocation20 + $0x98] sm:$0xff]  }
0x153b   :  { %3051 = vmatpush1.bf16.msra.mxu1 %v4209_v61  ;;  %v4259_v61 = vld [vmem:[#allocation20 + $0xe0] sm:$0xff]  }
0x153c   :  { %3052 = vmatprep.subr.bf16.mxu1 %v4217_v19  ;;  %v4261_v19 = vld [vmem:[#allocation20 + $0xa0] sm:$0xff]  }
0x153f   :  { %3053 = vmatpush1.bf16.msra.mxu1 %v4215_v14  ;;  %v4263_v14 = vld [vmem:[#allocation20 + $0xe8] sm:$0xff]  }
0x1540   :  { %3054 = vmatprep.subr.bf16.mxu1 %v4223_v13  ;;  %v4265_v13 = vld [vmem:[#allocation20 + $0xa8] sm:$0xff]  }
0x1543   :  { %3055 = vmatpush1.bf16.msra.mxu1 %v4221_v17  ;;  %v4267_v17 = vld [vmem:[#allocation20 + $0xf0] sm:$0xff]  }
0x1544   :  { %3056 = vmatprep.subr.bf16.mxu1 %v4229_v25  ;;  %v4269_v25 = vld [vmem:[#allocation20 + $0xb0] sm:$0xff]  }
0x1547   :  { %3057 = vmatpush1.bf16.msra.mxu1 %v4227_v27  ;;  %v4271_v27 = vld [vmem:[#allocation20 + $0xf8] sm:$0xff]  }
0x1548   :  { %3058 = vmatprep.subr.bf16.mxu1 %v4235_v29  ;;  %v4273_v29 = vld [vmem:[#allocation20 + $0xb8] sm:$0xff]  }
0x154b   :  { %3059 = vmatpush1.bf16.msra.mxu1 %v4233_v32 }
0x154c   :  { %3060 = vmatprep.subr.bf16.mxu1 %v4241_v34 }
0x154f   :  { %3061 = vmatpush1.bf16.msra.mxu1 %v4239_v4 }
0x1550   :  { %3704 = vmatprep.subr.bf16.mxu1 %v4243_v36 }
0x1605   :  { %v2778_v37 = vpop.f32.mrb[20].mxu1 }
0x1606   :  { %v2779_v45 = vadd.f32 %v2778_v37, %v2695_v18  ;;  %v3916_v52 = vpop.f32.mrb[21].mxu1 }
0x1607   :  { %v2781_v55 = vpop.f32.mrb[22].mxu1  ;;  %v5304_v52 = vld [vmem:[#allocation10 + $0x8] sm:$0x3] }
0x1608   :  { %v5284_v57 = vadd.f32 %v2779_v45, %v5130_v21  ;;  %v2782_v58 = vadd.f32 %v2781_v55, %v2695_v18  ;;  %v3917_v60 = vpop.f32.mrb[23].mxu1  ;;  %v4200_v21 = vld [vmem:[#allocation19 + $0x20] ss:$16 sps:$4 sm:$0xff]   ;;  %v2812_v45 = vrot.slane %v5280_v23, %v2811_v48  ;;  %v2818_v30 = vrot.slane %v5304_v52, %v4964_v44  ;;  %v4248_v23 = vld [vmem:[#allocation20 + $0x8] sm:$0xff]  }
0x1609   :  { %3006 = vmatpush1.bf16.msra.mxu0 %v4200_v21 }
0x160a   :  { %v5287_v63 = vadd.f32 %v2782_v58, %v5132_v1  ;;  %2787 = vadd.xlane.f32.xlu0 %v5284_v57  ;;  %3007 = vmatprep.subr.bf16.mxu0 %v4208_v10  ;;  %v4256_v10 = vld [vmem:[#allocation20 + $0x18] sm:$0xff]  }
0x160c   :  { %2789 = vadd.xlane.f32.xlu1 %v5287_v63 }
0x160d   :  { %3008 = vmatpush1.bf16.msra.mxu0 %v4206_v12  ;;  %v4258_v12 = vld [vmem:[#allocation20 + $0x60] sm:$0xff]  }
0x160e   :  { %3009 = vmatprep.subr.bf16.mxu0 %v4214_v20  ;;  %v4260_v20 = vld [vmem:[#allocation20 + $0x20] sm:$0xff]  }
0x1611   :  { %3010 = vmatpush1.bf16.msra.mxu0 %v4212_v62  ;;  %v4262_v62 = vld [vmem:[#allocation20 + $0x68] sm:$0xff]  }
0x1612   :  { %3011 = vmatprep.subr.bf16.mxu0 %v4220_v16  ;;  %v4264_v16 = vld [vmem:[#allocation20 + $0x28] sm:$0xff]  }
0x1615   :  { %3012 = vmatpush1.bf16.msra.mxu0 %v4218_v22  ;;  %v4266_v22 = vld [vmem:[#allocation20 + $0x70] sm:$0xff]  }
0x1616   :  { %3013 = vmatprep.subr.bf16.mxu0 %v4226_v24  ;;  %v4268_v24 = vld [vmem:[#allocation20 + $0x30] sm:$0xff]  }
0x1619   :  { %3014 = vmatpush1.bf16.msra.mxu0 %v4224_v26  ;;  %v4270_v26 = vld [vmem:[#allocation20 + $0x78] sm:$0xff]  }
0x161a   :  { %3015 = vmatprep.subr.bf16.mxu0 %v4232_v28  ;;  %v4272_v28 = vld [vmem:[#allocation20 + $0x38] sm:$0xff]  }
0x161d   :  { %3016 = vmatpush1.bf16.msra.mxu0 %v4230_v31  ;;  %v219_v31 = vld [vmem:[%s5343_s7] sm:$0xf]  ;;  %s4680_s7 = smov [#allocation22]  }
0x161e   :  { %3017 = vmatprep.subr.bf16.mxu0 %v4238_v51  ;;  %v2826_v32 = vrot.slane %v219_v31, %v4964_v44  ;;  %v2834_v51 = vrot.slane %v219_v31, %v4981_v59  ;;  %v2830_v34 = vrot.slane %v219_v31, %v4972_v49  ;;  %s3388_s22 = sshll.u32 %s4680_s7, 4  ;;  %s3389_s22 = int_to_ptr.vmem [resolvable:$true] %s3388_s22 }
0x161f   :  { %s4617_s10 = scalar_lea.vmem %s3389_s22, 256  ;;  %p4622_p13 = scmp.lt.s32.totalorder %s3389_s22, %s3389_s22 }
0x1620   :  { %p4618_p12 = scmp.ne.s32.totalorder %s3389_s22, %s4617_s10  ;;  %p4623_p0 = scmp.lt.s32.totalorder %s4617_s10, %s4617_s10 }
0x1621   :  { %3018 = vmatpush1.bf16.msra.mxu0 %v4236_v35  ;;  %v2838_v35 = vrot.slane %v219_v31, %v1630_v56 }
0x1622   :  { %3682 = vmatprep.subr.bf16.mxu0 %v4242_v15  ;;  %p4624_p1 = por %p4623_p0, %p4622_p13 }
0x1624   :  { %p4625_p2 = pnand %p4624_p1, %p4618_p12 }
0x1697   :  { %v2788_v1 = vpop.xlane.xlu0 %2787 }
0x1698   :  { %v2791_v6 = vmul.f32 0.0078125, %v2788_v1  ;;  %v4247_v1 = vld [vmem:[#allocation20 + $0xc8] sm:$0xff]  }
0x1699   :  { %v2790_v7 = vpop.xlane.xlu1 %2789 }
0x169a   :  { %v5292_v38 = vsub.f32 %v5284_v57, %v2791_v6  ;;  %v2792_v8 = vmul.f32 0.0078125, %v2790_v7  ;;  %v4249_v6 = vld [vmem:[#allocation20 + $0x88] sm:$0xff]   ;;  %v4250_v7 = vld [vmem:[#allocation20 + $0x50] sm:$0xff]  }
0x169c   :  { %v5295_v9 = vsub.f32 %v5287_v63, %v2792_v8  ;;  %v2795_v53 = vmul.f32 %v5292_v38, %v5292_v38  ;;  %v4252_v8 = vld [vmem:[#allocation20 + $0x10] sm:$0xff]  }
0x169e   :  { %2797 = vadd.xlane.f32.xlu0 %v2795_v53  ;;  %v2796_v54 = vmul.f32 %v5295_v9, %v5295_v9  ;;  %v4254_v53 = vld [vmem:[#allocation20 + $0x58] sm:$0xff]  }
0x16a2   :  { %2799 = vadd.xlane.f32.xlu0 %v2796_v54  ;;  %v4255_v54 = vld [vmem:[#allocation20 + $0xd8] sm:$0xff]  }
0x172b   :  { %v2798_v39 = vpop.xlane.xlu0 %2797 }
0x172c   :  { %v2801_v50 = vmul.f32 0.0078125, %v2798_v39 }
0x172e   :  { %v2803_v33 = vadd.f32 1e-06, %v2801_v50 }
0x172f   :  { %v2800_v40 = vpop.xlane.xlu0 %2799 }
0x1730   :  { %4346 = vrsqrt.f32 %v2803_v33  ;;  %v2802_v42 = vmul.f32 0.0078125, %v2800_v40 }
0x1732   :  { %v2804_v46 = vadd.f32 1e-06, %v2802_v42 }
0x1734   :  { %4348 = vrsqrt.f32 %v2804_v46 }
0x173a   :  { %v4347_v18 = vpop.eup %4346 }
0x173b   :  { %v2807_v37 = vmul.f32 %v4347_v18, %v5292_v38  ;;  %v4251_v38 = vld [vmem:[#allocation20 + $0xd0] sm:$0xff]  }
0x173d   :  { %v2813_v60 = vmul.f32 %v2812_v45, %v2807_v37 }
0x173e   :  { %v4349_v55 = vpop.eup %4348 }
0x173f   :  { %v2808_v58 = vmul.f32 %v4349_v55, %v5295_v9  ;;  %v2819_v2 = vadd.f32 %v2818_v30, %v2813_v60  ;;  %v4253_v9 = vld [vmem:[#allocation20 + $0x90] sm:$0xff]  }
0x1741   :  { %v2814_v0 = vmul.f32 %v2812_v45, %v2808_v58 }
0x1743   :  { %v2820_v3 = vadd.f32 %v2818_v30, %v2814_v0 }
0x1745   :  { %v2821_v21 = vpack.c.bf16 %v2820_v3, %v2819_v2 }
0x1747   :  { %3036 = vmatmul.mubr.bf16.vlgmr.msra.gmra.mrb[36].mxu0 %v2821_v21  ;;  %3079 = vmatmul.mubr.bf16.vlgmr.msra.gmra.mrb[24].mxu1 %v2821_v21 }
0x1748   :  { %3683 = vmatpush3.bf16.msra.mxu0 %v4244_v41  ;;  %3705 = vmatpush3.bf16.msra.mxu1 %v4245_v5 }
0x1749   :  { %3684 = vmatprep.subr.bf16.mxu0 %v4246_v47  ;;  %3706 = vmatprep.subr.bf16.mxu1 %v4247_v1 }
0x174c   :  { %3685 = vmatpush3.bf16.msra.mxu0 %v4248_v23  ;;  %3707 = vmatpush3.bf16.msra.mxu1 %v4249_v6  ;;  %v3104_v6 = vrot.slane %v5304_v52, %v4972_v49 }
0x174d   :  { %3686 = vmatprep.subr.bf16.mxu0 %v4250_v7  ;;  %3708 = vmatprep.subr.bf16.mxu1 %v4251_v38 }
0x1750   :  { %3687 = vmatpush3.bf16.msra.mxu0 %v4252_v8  ;;  %3709 = vmatpush3.bf16.msra.mxu1 %v4253_v9 }
0x1751   :  { %3688 = vmatprep.subr.bf16.mxu0 %v4254_v53  ;;  %3710 = vmatprep.subr.bf16.mxu1 %v4255_v54 }
0x1754   :  { %3689 = vmatpush3.bf16.msra.mxu0 %v4256_v10  ;;  %3711 = vmatpush3.bf16.msra.mxu1 %v4257_v11 }
0x1755   :  { %3690 = vmatprep.subr.bf16.mxu0 %v4258_v12  ;;  %3712 = vmatprep.subr.bf16.mxu1 %v4259_v61 }
0x1758   :  { %3691 = vmatpush3.bf16.msra.mxu0 %v4260_v20  ;;  %3713 = vmatpush3.bf16.msra.mxu1 %v4261_v19 }
0x1759   :  { %3692 = vmatprep.subr.bf16.mxu0 %v4262_v62  ;;  %3714 = vmatprep.subr.bf16.mxu1 %v4263_v14 }
0x175c   :  { %3693 = vmatpush3.bf16.msra.mxu0 %v4264_v16  ;;  %3715 = vmatpush3.bf16.msra.mxu1 %v4265_v13 }
0x175d   :  { %3694 = vmatprep.subr.bf16.mxu0 %v4266_v22  ;;  %3716 = vmatprep.subr.bf16.mxu1 %v4267_v17 }
0x1760   :  { %3695 = vmatpush3.bf16.msra.mxu0 %v4268_v24  ;;  %3717 = vmatpush3.bf16.msra.mxu1 %v4269_v25 }
0x1761   :  { %3696 = vmatprep.subr.bf16.mxu0 %v4270_v26  ;;  %3718 = vmatprep.subr.bf16.mxu1 %v4271_v27 }
0x1764   :  { %3697 = vmatpush3.bf16.msra.mxu0 %v4272_v28  ;;  %3719 = vmatpush3.bf16.msra.mxu1 %v4273_v29 }
0x181a   :  { %v3037_v4 = vpop.f32.mrb[36].mxu0  ;;  %v3080_v15 = vpop.f32.mrb[24].mxu1 }
0x181b   :  { %v3038_v36 = vadd.f32 %v3037_v4, %v2826_v32  ;;  %v3081_v39 = vadd.f32 %v3080_v15, %v2834_v51  ;;  %v3039_v50 = vpop.f32.mrb[37].mxu0  ;;  %v3082_v33 = vpop.f32.mrb[25].mxu1 }
0x181c   :  { %v3040_v40 = vadd.f32 %v3039_v50, %v2830_v34  ;;  %v3083_v42 = vadd.f32 %v3082_v33, %v2838_v35  ;;  %v3041_v46 = vpop.f32.mrb[38].mxu0  ;;  %v3084_v48 = vpop.f32.mrb[26].mxu1 }
0x181d   :  { %v3042_v18 = vadd.f32 %v3041_v46, %v2826_v32  ;;  %v3085_v37 = vadd.f32 %v3084_v48, %v2834_v51  ;;  %v3043_v44 = vpop.f32.mrb[39].mxu0  ;;  %v3086_v45 = vpop.f32.mrb[27].mxu1  ;;  %v3089_v58 = vmax.f32 %v3038_v36, 0.0  ;;  %v3091_v60 = vmax.f32 %v3081_v39, 0.0 }
0x181e   :  { %v3044_v59 = vadd.f32 %v3043_v44, %v2830_v34  ;;  %v3087_v55 = vadd.f32 %v3086_v45, %v2838_v35  ;;  %v3090_v30 = vmax.f32 %v3040_v40, 0.0  ;;  %v3092_v0 = vmax.f32 %v3083_v42, 0.0 }
0x181f   :  { %v3093_v43 = vmax.f32 %v3042_v18, 0.0  ;;  %v3095_v56 = vmax.f32 %v3085_v37, 0.0 }
0x1820   :  { %v3094_v2 = vmax.f32 %v3044_v59, 0.0  ;;  %v3096_v3 = vmax.f32 %v3087_v55, 0.0 }
0x1821   :  { %v3097_v41 = vpack.c.bf16 %v3093_v43, %v3089_v58  ;;  %v3099_v5 = vpack.c.bf16 %v3095_v56, %v3091_v60 }
0x1822   :  { %v3098_v21 = vpack.c.bf16 %v3094_v2, %v3090_v30  ;;  %v3100_v47 = vpack.c.bf16 %v3096_v3, %v3092_v0 }
0x1824   :  { %3329 = vmatprep.mubr.bf16.mxu0 %v3098_v21  ;;  %3370 = vmatprep.mubr.bf16.mxu1 %v3100_v47 }
0x1825   :  { %3330 = vmatmul.mubr.bf16.vlgmr.msra.gmra.mrb[40].mxu0 %v3097_v41  ;;  %3371 = vmatmul.mubr.bf16.vlgmr.msra.gmra.mrb[28].mxu1 %v3099_v5 }
0x18f8   :  { %v3698_v1 = vpop.f32.mrb[40].mxu0  ;;  %v3720_v23 = vpop.f32.mrb[28].mxu1 }
0x18f9   :  { %v3699_v7 = vpop.f32.mrb[41].mxu0  ;;  %v3721_v38 = vpop.f32.mrb[29].mxu1 }
0x18fa   :  { %v3700_v8 = vadd.f32 %v3699_v7, %v3698_v1  ;;  %v3722_v9 = vadd.f32 %v3721_v38, %v3720_v23  ;;  %v3701_v53 = vpop.f32.mrb[42].mxu0  ;;  %v3723_v54 = vpop.f32.mrb[30].mxu1 }
0x18fb   :  { %v3702_v10 = vpop.f32.mrb[43].mxu0  ;;  %v3724_v11 = vpop.f32.mrb[31].mxu1 }
0x18fc   :  { %v3332_v12 = vadd.f32 %v3700_v8, %v3104_v6  ;;  %v3703_v61 = vadd.f32 %v3702_v10, %v3701_v53  ;;  %v3725_v20 = vadd.f32 %v3724_v11, %v3723_v54 }
0x18fe   :  { %v3373_v19 = vadd.f32 %v3722_v9, %v3332_v12  ;;  %v3335_v62 = vadd.f32 %v3703_v61, %v3104_v6 }
0x1900   :  { %v3379_v14 = vadd.f32 %v3373_v19, %v5284_v57  ;;  %v3376_v16 = vadd.f32 %v3725_v20, %v3335_v62 }
0x1902   :  { %3381 = vst [vmem:[#allocation22] sm:$0xff] %v3379_v14  ;;  %v3380_v49 = vadd.f32 %v3376_v16, %v5287_v63 }
0x1904   :  { %3382 = vst [vmem:[#allocation22 + $0x8] sm:$0xff] %v3380_v49 }
0x1905   :  { %4628 = shalt.err (!%p4625_p2)
}
0x1906   :  { %s4629_s29 = scalar_lea.hbm %s5351_s15, 256 }
0x1907   :  { %p4630_p3 = scmp.ne.s32.totalorder %s5351_s15, %s4629_s29  ;;  %p4633_p4 = scmp.lt.u32.totalorder %s4629_s29, %s5351_s15 }
0x1909   :  { %p4635_p5 = pnand %p4633_p4, %p4630_p3 }
0x190b   :  { %4638 = shalt.err (!%p4635_p5)
}
0x190c   :  { %3394 = dma.vmem_to_hbm [thread:$0]  %s3389_s22, 256, %s5351_s15, [#allocation4], %s5354_s20, %s5354_s20, %s4658_s16  }
0x190d   :  { %4653 = dma.done.wait [#allocation4], 256  }
0x190e   :  { %4654 = vsyncadd [#allocation4], 4294967040 }
0x190f   :  { %3398 = vsyncpa [#allocation3], 1 }
0x1910   :  { %3399 = vsyncpa [#allocation6], 1 }
0x1911   :  { %3400 = vsyncpa [#allocation9], 1 }
0x1912   :  { %3401 = vsyncpa [#allocation12], 1 }
0x1913   :  { %3402 = vsyncpa [#allocation15], 1 }
0x1914   :  { %3403 = vsyncpa [#allocation18], 1 }
0x1915   :  { %3404 = vsyncpa [#allocation21], 1 }
0x1916   :  { %3405 = vsyncpa [#allocation4], 1 }

</bundles_post_ra>
